<compile_context>
chip_gen: v6e
topology: v6e:2x2x1
jax: 0.10.0
libtpu: 0.0.40
codegen_flags: <defaults>
</compile_context>

<pallas_src>
import functools

import numpy as np

import jax
import jax.numpy as jnp
from jax import lax
from jax.experimental import pallas as pl
from jax.experimental.pallas import tpu as pltpu

_BN_EPS = 1e-5


# -----------------------------------------------------------------------------
# Fused kernel
# -----------------------------------------------------------------------------
def downconv_fused_kernel(x_ref, wb1_ref, wb2_ref, g1_ref, be1_ref,
                          g2_ref, be2_ref, sel_ref, selt_ref,
                          o_ref, xpad_ref, hpad_ref, *, mxu_dtype):
    # x_ref    : (N, H, W*Cin)        lane-dense NHWC input slab (f32)
    # wb1_ref  : (3, W*Cin,  W*Cout)  conv1 band weights (one per ky)
    # wb2_ref  : (3, W*Cout, W*Cout)  conv2 band weights
    # g*/be*   : (1, Cout)            BN gamma / beta (f32)
    # sel_ref  : (W*Cout, Cout)       one-hot channel selector (lane -> chan)
    # selt_ref : (Cout, W*Cout)       its transpose (chan -> lane broadcast)
    # o_ref    : (N, H, W*Cout)
    # xpad_ref : (N, H+2, W*Cin)      f32 H-halo scratch for conv1
    # hpad_ref : (N, H+2, W*Cout)     f32 H-halo scratch for conv2
    N, H, WCin = x_ref.shape
    WCout = o_ref.shape[-1]
    Cout = g1_ref.shape[-1]
    W = WCout // Cout
    NH = N * H
    inv_cnt = 1.0 / float(N * H * W)

    def conv_band(pad_ref, wb_ref):
        # 3 fat-K matmuls per image; accumulator is (H, W*Cout) = 2 f32 vregs.
        rows = []
        for n in range(N):
            acc = jnp.zeros((H, WCout), jnp.float32)
            for ky in range(3):
                xk = pad_ref[n, ky:ky + H, :].astype(mxu_dtype)
                acc = acc + jnp.dot(xk, wb_ref[ky],
                                    preferred_element_type=jnp.float32)
            rows.append(acc)
        return jnp.concatenate(rows, axis=0)          # (N*H, W*Cout)

    def bn_relu(y, g_ref, be_ref):
        # Train-mode BatchNorm (biased variance) + ReLU on a lane-dense slab.
        # Channels repeat every Cout lanes, so the lane-group reduction and
        # the per-channel broadcast both ride the (idle) MXU via sel / selT.
        mean_c = jnp.sum(jnp.dot(y, sel_ref[...],
                                 preferred_element_type=jnp.float32),
                         axis=0, keepdims=True) * inv_cnt            # (1, C)
        mean_wc = jnp.dot(mean_c, selt_ref[...],
                          preferred_element_type=jnp.float32)        # (1, W*C)
        d = y - mean_wc
        var_c = jnp.sum(jnp.dot(d * d, sel_ref[...],
                                preferred_element_type=jnp.float32),
                        axis=0, keepdims=True) * inv_cnt             # (1, C)
        scale_c = g_ref[...] * lax.rsqrt(var_c + _BN_EPS)
        shift_c = be_ref[...] - mean_c * scale_c
        scale_wc = jnp.dot(scale_c, selt_ref[...],
                           preferred_element_type=jnp.float32)
        shift_wc = jnp.dot(shift_c, selt_ref[...],
                           preferred_element_type=jnp.float32)
        return jnp.maximum(y * scale_wc + shift_wc, 0.0)

    # ---- conv1: H-halo in VMEM (zero border rows only), 3 band matmuls -----
    xpad_ref[:, 0:1, :] = jnp.zeros((N, 1, WCin), xpad_ref.dtype)
    xpad_ref[:, H + 1:H + 2, :] = jnp.zeros((N, 1, WCin), xpad_ref.dtype)
    xpad_ref[:, 1:H + 1, :] = x_ref[...].astype(xpad_ref.dtype)
    h1 = bn_relu(conv_band(xpad_ref, wb1_ref), g1_ref, be1_ref)

    # ---- conv2: intermediate never touches HBM ------------------------------
    hpad_ref[:, 0:1, :] = jnp.zeros((N, 1, WCout), hpad_ref.dtype)
    hpad_ref[:, H + 1:H + 2, :] = jnp.zeros((N, 1, WCout), hpad_ref.dtype)
    hpad_ref[:, 1:H + 1, :] = h1.reshape(N, H, WCout).astype(hpad_ref.dtype)
    h2 = bn_relu(conv_band(hpad_ref, wb2_ref), g2_ref, be2_ref)

    # Lane-dense (W*Cout = 128) full-width unmasked store.
    o_ref[...] = h2.reshape(N, H, WCout).astype(o_ref.dtype)


# -----------------------------------------------------------------------------
# Wrapper-side helpers (weight banding, channel selectors)
# -----------------------------------------------------------------------------
def _band_weights(w_taps, width):
    """(3,3,Cin,Cout) HWIO taps -> (3, W*Cin, W*Cout) block-tridiagonal bands.

    band[ky][w_in*Cin+ci, w_out*Cout+co] = w[ky, w_in-w_out+1, ci, co] for
    |w_in-w_out| <= 1, so W-boundary zero padding is built into the matrix.
    """
    _, _, cin, cout = w_taps.shape
    m = np.zeros((3, width, width), np.float32)
    for kx in range(3):
        for wo in range(width):
            wi = wo + kx - 1
            if 0 <= wi < width:
                m[kx, wi, wo] = 1.0
    band = jnp.einsum("yxio,xab->yaibo", w_taps, jnp.asarray(m))
    return band.reshape(3, width * cin, width * cout)


def _channel_select(width, cout):
    """One-hot (W*C, C) lane->channel selector and its transpose."""
    sel = np.zeros((width * cout, cout), np.float32)
    sel[np.arange(width * cout), np.arange(width * cout) % cout] = 1.0
    return jnp.asarray(sel), jnp.asarray(np.ascontiguousarray(sel.T))


# -----------------------------------------------------------------------------
# Pallas-call wrappers
# -----------------------------------------------------------------------------
def downconv_nhwc(x_nhwc, params, mxu_dtype=jnp.float32):
    """Fused DownConv on an NHWC tensor (lane-dense core path)."""
    N, H, W, Cin = x_nhwc.shape
    Cout = params["w1"].shape[-1]
    WCin, WCout = W * Cin, W * Cout

    x2d = x_nhwc.reshape(N, H, WCin)                       # free row-major view
    wb1 = _band_weights(params["w1"], W).astype(mxu_dtype)
    wb2 = _band_weights(params["w2"], W).astype(mxu_dtype)
    g1 = params["g1"].reshape(1, Cout).astype(jnp.float32)
    be1 = params["be1"].reshape(1, Cout).astype(jnp.float32)
    g2 = params["g2"].reshape(1, Cout).astype(jnp.float32)
    be2 = params["be2"].reshape(1, Cout).astype(jnp.float32)
    sel, selt = _channel_select(W, Cout)

    kernel = functools.partial(downconv_fused_kernel, mxu_dtype=mxu_dtype)

    y2d = pl.pallas_call(
        kernel,
        out_shape=jax.ShapeDtypeStruct((N, H, WCout), x_nhwc.dtype),
        grid=(1,),
        in_specs=[
            pl.BlockSpec((N, H, WCin), lambda i: (0, 0, 0)),
            pl.BlockSpec((3, WCin, WCout), lambda i: (0, 0, 0)),
            pl.BlockSpec((3, WCout, WCout), lambda i: (0, 0, 0)),
            pl.BlockSpec((1, Cout), lambda i: (0, 0)),
            pl.BlockSpec((1, Cout), lambda i: (0, 0)),
            pl.BlockSpec((1, Cout), lambda i: (0, 0)),
            pl.BlockSpec((1, Cout), lambda i: (0, 0)),
            pl.BlockSpec((WCout, Cout), lambda i: (0, 0)),
            pl.BlockSpec((Cout, WCout), lambda i: (0, 0)),
        ],
        out_specs=pl.BlockSpec((N, H, WCout), lambda i: (0, 0, 0)),
        scratch_shapes=[
            pltpu.VMEM((N, H + 2, WCin), jnp.float32),
            pltpu.VMEM((N, H + 2, WCout), jnp.float32),
        ],
        compiler_params=pltpu.CompilerParams(
            dimension_semantics=("arbitrary",),
        ),
    )(x2d, wb1, wb2, g1, be1, g2, be2, sel, selt)

    return y2d.reshape(N, H, W, Cout)


@functools.partial(jax.jit, static_argnames=("mxu_dtype",))
def downconv_forward(x_nchw, params, mxu_dtype=jnp.float32):
    """PyTorch-parity entry point: NCHW in, NCHW out (thin adapter)."""
    x = jnp.transpose(x_nchw, (0, 2, 3, 1))
    y = downconv_nhwc(x, params, mxu_dtype)
    return jnp.transpose(y, (0, 3, 1, 2))


# -----------------------------------------------------------------------------
# Parameter init (PyTorch defaults) and pure-JAX reference
# -----------------------------------------------------------------------------
def init_downconv_params(key, in_channels, out_channels):
    """PyTorch-style init.  Conv biases are kept for state-dict parity but are
    not used by the kernel (they cancel exactly under train-mode BatchNorm)."""
    def conv_params(k, cin, cout):
        k1, k2 = jax.random.split(k)
        bound = 1.0 / (cin * 9) ** 0.5
        w_oihw = jax.random.uniform(k1, (cout, cin, 3, 3), jnp.float32,
                                    -bound, bound)
        b = jax.random.uniform(k2, (cout,), jnp.float32, -bound, bound)
        w_hwio = jnp.transpose(w_oihw, (2, 3, 1, 0))       # (ky, kx, cin, cout)
        return w_hwio, b

    ka, kb = jax.random.split(key)
    w1, b1 = conv_params(ka, in_channels, out_channels)
    w2, b2 = conv_params(kb, out_channels, out_channels)
    return dict(
        w1=w1, b1=b1,
        g1=jnp.ones((out_channels,), jnp.float32),
        be1=jnp.zeros((out_channels,), jnp.float32),
        w2=w2, b2=b2,
        g2=jnp.ones((out_channels,), jnp.float32),
        be2=jnp.zeros((out_channels,), jnp.float32))


def downconv_reference(x_nchw, params):
    """Op-for-op reference: conv WITH bias -> train-mode BN -> ReLU, twice."""
    def conv(x, w_hwio, b):
        y = lax.conv_general_dilated(
            x, w_hwio, window_strides=(1, 1), padding="SAME",
            dimension_numbers=("NHWC", "HWIO", "NHWC"))
        return y + b[None, None, None, :]

    def bn_relu(x, g, b):
        mean = jnp.mean(x, axis=(0, 1, 2), keepdims=True)
        var = jnp.mean((x - mean) ** 2, axis=(0, 1, 2), keepdims=True)
        return jnp.maximum((x - mean) * lax.rsqrt(var + _BN_EPS) * g + b, 0.0)

    x = jnp.transpose(x_nchw, (0, 2, 3, 1))
    h = bn_relu(conv(x, params["w1"], params["b1"]), params["g1"], params["be1"])
    h = bn_relu(conv(h, params["w2"], params["b2"]), params["g2"], params["be2"])
    return jnp.transpose(h, (0, 3, 1, 2))


if __name__ == "__main__":
    key = jax.random.PRNGKey(0)
    k_x, k_p = jax.random.split(key)

    N, C_in, C_out, H, W = 2, 4, 8, 16, 16
    x = jax.random.normal(k_x, (N, C_in, H, W), jnp.float32)
    params = init_downconv_params(k_p, C_in, C_out)

    ref = downconv_reference(x, params)

    # f32 MXU operands (v5e default): tight check vs PyTorch-semantics ref.
    out = jax.block_until_ready(downconv_forward(x, params))
    assert out.shape == (N, C_out, H, W), out.shape
    err = float(jnp.max(jnp.abs(out - ref)))
    assert err < 1e-4, err

    # bf16 MXU operands (v6e/v7x path): f32 accumulation + f32 BN math; loose
    # tolerance because bf16 operand rounding propagates through two conv+BN
    # stages.
    out_bf16 = jax.block_until_ready(
        downconv_forward(x, params, mxu_dtype=jnp.bfloat16))
    err_bf16 = float(jnp.max(jnp.abs(out_bf16 - ref)))
    assert err_bf16 < 2e-1, err_bf16

    print("KERNEL_OK")
</pallas_src>

<mosaic_0001>
module attributes {stable_mosaic.version = 11 : i64} {
  func.func @downconv_fused_kernel(%arg0: i32, %arg1: memref<2x16x64xf32, #tpu.memory_space<vmem>>, %arg2: memref<3x64x128xf32, #tpu.memory_space<vmem>>, %arg3: memref<3x128x128xf32, #tpu.memory_space<vmem>>, %arg4: memref<1x8xf32, #tpu.memory_space<vmem>>, %arg5: memref<1x8xf32, #tpu.memory_space<vmem>>, %arg6: memref<1x8xf32, #tpu.memory_space<vmem>>, %arg7: memref<1x8xf32, #tpu.memory_space<vmem>>, %arg8: memref<128x8xf32, #tpu.memory_space<vmem>>, %arg9: memref<8x128xf32, #tpu.memory_space<vmem>>, %arg10: memref<2x16x128xf32, #tpu.memory_space<vmem>>, %arg11: memref<2x18x64xf32, #tpu.memory_space<vmem>>, %arg12: memref<2x18x128xf32, #tpu.memory_space<vmem>>) attributes {dimension_semantics = [#tpu.dimension_semantics<arbitrary>], iteration_bounds = array<i64: 1>, scalar_prefetch = 0 : i64, scratch_operands = 2 : i64, tpu.core_type = #tpu.core_type<tc>, window_params = [{pipeline_mode = #tpu.pipeline_mode<synchronous>, transform_indices = @transform_0, window_bounds = array<i64: 2, 16, 64>}, {pipeline_mode = #tpu.pipeline_mode<synchronous>, transform_indices = @transform_1, window_bounds = array<i64: 3, 64, 128>}, {pipeline_mode = #tpu.pipeline_mode<synchronous>, transform_indices = @transform_2, window_bounds = array<i64: 3, 128, 128>}, {pipeline_mode = #tpu.pipeline_mode<synchronous>, transform_indices = @transform_3, window_bounds = array<i64: 1, 8>}, {pipeline_mode = #tpu.pipeline_mode<synchronous>, transform_indices = @transform_4, window_bounds = array<i64: 1, 8>}, {pipeline_mode = #tpu.pipeline_mode<synchronous>, transform_indices = @transform_5, window_bounds = array<i64: 1, 8>}, {pipeline_mode = #tpu.pipeline_mode<synchronous>, transform_indices = @transform_6, window_bounds = array<i64: 1, 8>}, {pipeline_mode = #tpu.pipeline_mode<synchronous>, transform_indices = @transform_7, window_bounds = array<i64: 128, 8>}, {pipeline_mode = #tpu.pipeline_mode<synchronous>, transform_indices = @transform_8, window_bounds = array<i64: 8, 128>}, {pipeline_mode = #tpu.pipeline_mode<synchronous>, transform_indices = @transform_9, window_bounds = array<i64: 2, 16, 128>}]} {
    %cst = arith.constant 0.000000e+00 : f32
    %0 = vector.broadcast %cst : f32 to vector<2x1x64xf32>
    %c0 = arith.constant 0 : index
    %c0_0 = arith.constant 0 : index
    %c0_1 = arith.constant 0 : index
    %1 = vector.load %arg11[%c0, %c0_0, %c0_1] : memref<2x18x64xf32, #tpu.memory_space<vmem>>, vector<2x1x64xf32>
    tpu.vector_store %arg11[%c0, %c0_0, %c0_1], %0 {strides = array<i32>} : memref<2x18x64xf32, #tpu.memory_space<vmem>>, vector<2x1x64xf32>,
    %cst_2 = arith.constant 0.000000e+00 : f32
    %2 = vector.broadcast %cst_2 : f32 to vector<2x1x64xf32>
    %c0_3 = arith.constant 0 : index
    %c17 = arith.constant 17 : index
    %c0_4 = arith.constant 0 : index
    %3 = vector.load %arg11[%c0_3, %c17, %c0_4] : memref<2x18x64xf32, #tpu.memory_space<vmem>>, vector<2x1x64xf32>
    tpu.vector_store %arg11[%c0_3, %c17, %c0_4], %2 {strides = array<i32>} : memref<2x18x64xf32, #tpu.memory_space<vmem>>, vector<2x1x64xf32>,
    %c0_5 = arith.constant 0 : index
    %c0_6 = arith.constant 0 : index
    %c0_7 = arith.constant 0 : index
    %4 = vector.load %arg1[%c0_5, %c0_6, %c0_7] : memref<2x16x64xf32, #tpu.memory_space<vmem>>, vector<2x16x64xf32>
    %c0_8 = arith.constant 0 : index
    %c1 = arith.constant 1 : index
    %c0_9 = arith.constant 0 : index
    %5 = vector.load %arg11[%c0_8, %c1, %c0_9] : memref<2x18x64xf32, #tpu.memory_space<vmem>>, vector<2x16x64xf32>
    tpu.vector_store %arg11[%c0_8, %c1, %c0_9], %4 {strides = array<i32>} : memref<2x18x64xf32, #tpu.memory_space<vmem>>, vector<2x16x64xf32>,
    %cst_10 = arith.constant 0.000000e+00 : f32
    %6 = vector.broadcast %cst_10 : f32 to vector<16x128xf32>
    %c0_11 = arith.constant 0 : index
    %c0_12 = arith.constant 0 : index
    %c0_13 = arith.constant 0 : index
    %7 = vector.load %arg11[%c0_11, %c0_12, %c0_13] : memref<2x18x64xf32, #tpu.memory_space<vmem>>, vector<1x16x64xf32>
    %8 = vector.shape_cast %7 : vector<1x16x64xf32> to vector<16x64xf32>
    %c0_14 = arith.constant 0 : index
    %c0_15 = arith.constant 0 : index
    %c0_16 = arith.constant 0 : index
    %9 = vector.load %arg2[%c0_14, %c0_15, %c0_16] : memref<3x64x128xf32, #tpu.memory_space<vmem>>, vector<1x64x128xf32>
    %10 = vector.shape_cast %9 : vector<1x64x128xf32> to vector<64x128xf32>
    %cst_17 = arith.constant dense<0.000000e+00> : vector<16x128xf32>
    %11 = tpu.matmul %8, %10, %cst_17 {dimension_numbers = #tpu.dot_dimension_numbers<[1], [0], [0], [1], [0, 0, 1, 1], [], []>} : vector<16x64xf32>, vector<64x128xf32>, vector<16x128xf32> -> vector<16x128xf32>
    %12 = arith.addf %6, %11 : vector<16x128xf32>
    %c0_18 = arith.constant 0 : index
    %c1_19 = arith.constant 1 : index
    %c0_20 = arith.constant 0 : index
    %13 = vector.load %arg11[%c0_18, %c1_19, %c0_20] : memref<2x18x64xf32, #tpu.memory_space<vmem>>, vector<1x16x64xf32>
    %14 = vector.shape_cast %13 : vector<1x16x64xf32> to vector<16x64xf32>
    %c1_21 = arith.constant 1 : index
    %c0_22 = arith.constant 0 : index
    %c0_23 = arith.constant 0 : index
    %15 = vector.load %arg2[%c1_21, %c0_22, %c0_23] : memref<3x64x128xf32, #tpu.memory_space<vmem>>, vector<1x64x128xf32>
    %16 = vector.shape_cast %15 : vector<1x64x128xf32> to vector<64x128xf32>
    %cst_24 = arith.constant dense<0.000000e+00> : vector<16x128xf32>
    %17 = tpu.matmul %14, %16, %cst_24 {dimension_numbers = #tpu.dot_dimension_numbers<[1], [0], [0], [1], [0, 0, 1, 1], [], []>} : vector<16x64xf32>, vector<64x128xf32>, vector<16x128xf32> -> vector<16x128xf32>
    %18 = arith.addf %12, %17 : vector<16x128xf32>
    %c0_25 = arith.constant 0 : index
    %c2 = arith.constant 2 : index
    %c0_26 = arith.constant 0 : index
    %19 = vector.load %arg11[%c0_25, %c2, %c0_26] : memref<2x18x64xf32, #tpu.memory_space<vmem>>, vector<1x16x64xf32>
    %20 = vector.shape_cast %19 : vector<1x16x64xf32> to vector<16x64xf32>
    %c2_27 = arith.constant 2 : index
    %c0_28 = arith.constant 0 : index
    %c0_29 = arith.constant 0 : index
    %21 = vector.load %arg2[%c2_27, %c0_28, %c0_29] : memref<3x64x128xf32, #tpu.memory_space<vmem>>, vector<1x64x128xf32>
    %22 = vector.shape_cast %21 : vector<1x64x128xf32> to vector<64x128xf32>
    %cst_30 = arith.constant dense<0.000000e+00> : vector<16x128xf32>
    %23 = tpu.matmul %20, %22, %cst_30 {dimension_numbers = #tpu.dot_dimension_numbers<[1], [0], [0], [1], [0, 0, 1, 1], [], []>} : vector<16x64xf32>, vector<64x128xf32>, vector<16x128xf32> -> vector<16x128xf32>
    %24 = arith.addf %18, %23 : vector<16x128xf32>
    %cst_31 = arith.constant 0.000000e+00 : f32
    %25 = vector.broadcast %cst_31 : f32 to vector<16x128xf32>
    %c1_32 = arith.constant 1 : index
    %c0_33 = arith.constant 0 : index
    %c0_34 = arith.constant 0 : index
    %26 = vector.load %arg11[%c1_32, %c0_33, %c0_34] : memref<2x18x64xf32, #tpu.memory_space<vmem>>, vector<1x16x64xf32>
    %27 = vector.shape_cast %26 : vector<1x16x64xf32> to vector<16x64xf32>
    %c0_35 = arith.constant 0 : index
    %c0_36 = arith.constant 0 : index
    %c0_37 = arith.constant 0 : index
    %28 = vector.load %arg2[%c0_35, %c0_36, %c0_37] : memref<3x64x128xf32, #tpu.memory_space<vmem>>, vector<1x64x128xf32>
    %29 = vector.shape_cast %28 : vector<1x64x128xf32> to vector<64x128xf32>
    %cst_38 = arith.constant dense<0.000000e+00> : vector<16x128xf32>
    %30 = tpu.matmul %27, %29, %cst_38 {dimension_numbers = #tpu.dot_dimension_numbers<[1], [0], [0], [1], [0, 0, 1, 1], [], []>} : vector<16x64xf32>, vector<64x128xf32>, vector<16x128xf32> -> vector<16x128xf32>
    %31 = arith.addf %25, %30 : vector<16x128xf32>
    %c1_39 = arith.constant 1 : index
    %c1_40 = arith.constant 1 : index
    %c0_41 = arith.constant 0 : index
    %32 = vector.load %arg11[%c1_39, %c1_40, %c0_41] : memref<2x18x64xf32, #tpu.memory_space<vmem>>, vector<1x16x64xf32>
    %33 = vector.shape_cast %32 : vector<1x16x64xf32> to vector<16x64xf32>
    %c1_42 = arith.constant 1 : index
    %c0_43 = arith.constant 0 : index
    %c0_44 = arith.constant 0 : index
    %34 = vector.load %arg2[%c1_42, %c0_43, %c0_44] : memref<3x64x128xf32, #tpu.memory_space<vmem>>, vector<1x64x128xf32>
    %35 = vector.shape_cast %34 : vector<1x64x128xf32> to vector<64x128xf32>
    %cst_45 = arith.constant dense<0.000000e+00> : vector<16x128xf32>
    %36 = tpu.matmul %33, %35, %cst_45 {dimension_numbers = #tpu.dot_dimension_numbers<[1], [0], [0], [1], [0, 0, 1, 1], [], []>} : vector<16x64xf32>, vector<64x128xf32>, vector<16x128xf32> -> vector<16x128xf32>
    %37 = arith.addf %31, %36 : vector<16x128xf32>
    %c1_46 = arith.constant 1 : index
    %c2_47 = arith.constant 2 : index
    %c0_48 = arith.constant 0 : index
    %38 = vector.load %arg11[%c1_46, %c2_47, %c0_48] : memref<2x18x64xf32, #tpu.memory_space<vmem>>, vector<1x16x64xf32>
    %39 = vector.shape_cast %38 : vector<1x16x64xf32> to vector<16x64xf32>
    %c2_49 = arith.constant 2 : index
    %c0_50 = arith.constant 0 : index
    %c0_51 = arith.constant 0 : index
    %40 = vector.load %arg2[%c2_49, %c0_50, %c0_51] : memref<3x64x128xf32, #tpu.memory_space<vmem>>, vector<1x64x128xf32>
    %41 = vector.shape_cast %40 : vector<1x64x128xf32> to vector<64x128xf32>
    %cst_52 = arith.constant dense<0.000000e+00> : vector<16x128xf32>
    %42 = tpu.matmul %39, %41, %cst_52 {dimension_numbers = #tpu.dot_dimension_numbers<[1], [0], [0], [1], [0, 0, 1, 1], [], []>} : vector<16x64xf32>, vector<64x128xf32>, vector<16x128xf32> -> vector<16x128xf32>
    %43 = arith.addf %37, %42 : vector<16x128xf32>
    %44 = tpu.concatenate %24, %43 in 0 : vector<16x128xf32>, vector<16x128xf32> -> vector<32x128xf32>
    %c0_53 = arith.constant 0 : index
    %c0_54 = arith.constant 0 : index
    %45 = vector.load %arg8[%c0_53, %c0_54] : memref<128x8xf32, #tpu.memory_space<vmem>>, vector<128x8xf32>
    %cst_55 = arith.constant dense<0.000000e+00> : vector<32x8xf32>
    %46 = tpu.matmul %44, %45, %cst_55 {dimension_numbers = #tpu.dot_dimension_numbers<[1], [0], [0], [1], [0, 0, 1, 1], [], []>} : vector<32x128xf32>, vector<128x8xf32>, vector<32x8xf32> -> vector<32x8xf32>
    %cst_56 = arith.constant dense<0.000000e+00> : vector<8xf32>
    %47 = vector.multi_reduction <add>, %46, %cst_56 [0] : vector<32x8xf32> to vector<8xf32>
    %48 = vector.shape_cast %47 : vector<8xf32> to vector<1x8xf32>
    %cst_57 = arith.constant 0.001953125 : f32
    %49 = vector.broadcast %cst_57 : f32 to vector<1x8xf32>
    %50 = arith.mulf %48, %49 : vector<1x8xf32>
    %c0_58 = arith.constant 0 : index
    %c0_59 = arith.constant 0 : index
    %51 = vector.load %arg9[%c0_58, %c0_59] : memref<8x128xf32, #tpu.memory_space<vmem>>, vector<8x128xf32>
    %cst_60 = arith.constant dense<0.000000e+00> : vector<1x128xf32>
    %52 = tpu.matmul %50, %51, %cst_60 {dimension_numbers = #tpu.dot_dimension_numbers<[1], [0], [0], [1], [0, 0, 1, 1], [], []>} : vector<1x8xf32>, vector<8x128xf32>, vector<1x128xf32> -> vector<1x128xf32>
    %53 = vector.broadcast %52 : vector<1x128xf32> to vector<32x128xf32>
    %54 = arith.subf %44, %53 : vector<32x128xf32>
    %55 = arith.mulf %54, %54 : vector<32x128xf32>
    %c0_61 = arith.constant 0 : index
    %c0_62 = arith.constant 0 : index
    %56 = vector.load %arg8[%c0_61, %c0_62] : memref<128x8xf32, #tpu.memory_space<vmem>>, vector<128x8xf32>
    %cst_63 = arith.constant dense<0.000000e+00> : vector<32x8xf32>
    %57 = tpu.matmul %55, %56, %cst_63 {dimension_numbers = #tpu.dot_dimension_numbers<[1], [0], [0], [1], [0, 0, 1, 1], [], []>} : vector<32x128xf32>, vector<128x8xf32>, vector<32x8xf32> -> vector<32x8xf32>
    %cst_64 = arith.constant dense<0.000000e+00> : vector<8xf32>
    %58 = vector.multi_reduction <add>, %57, %cst_64 [0] : vector<32x8xf32> to vector<8xf32>
    %59 = vector.shape_cast %58 : vector<8xf32> to vector<1x8xf32>
    %cst_65 = arith.constant 0.001953125 : f32
    %60 = vector.broadcast %cst_65 : f32 to vector<1x8xf32>
    %61 = arith.mulf %59, %60 : vector<1x8xf32>
    %c0_66 = arith.constant 0 : index
    %c0_67 = arith.constant 0 : index
    %62 = vector.load %arg4[%c0_66, %c0_67] : memref<1x8xf32, #tpu.memory_space<vmem>>, vector<1x8xf32>
    %cst_68 = arith.constant 9.99999974E-6 : f32
    %63 = vector.broadcast %cst_68 : f32 to vector<1x8xf32>
    %64 = arith.addf %61, %63 : vector<1x8xf32>
    %65 = math.rsqrt %64 : vector<1x8xf32>
    %66 = arith.mulf %62, %65 : vector<1x8xf32>
    %c0_69 = arith.constant 0 : index
    %c0_70 = arith.constant 0 : index
    %67 = vector.load %arg5[%c0_69, %c0_70] : memref<1x8xf32, #tpu.memory_space<vmem>>, vector<1x8xf32>
    %68 = arith.mulf %50, %66 : vector<1x8xf32>
    %69 = arith.subf %67, %68 : vector<1x8xf32>
    %c0_71 = arith.constant 0 : index
    %c0_72 = arith.constant 0 : index
    %70 = vector.load %arg9[%c0_71, %c0_72] : memref<8x128xf32, #tpu.memory_space<vmem>>, vector<8x128xf32>
    %cst_73 = arith.constant dense<0.000000e+00> : vector<1x128xf32>
    %71 = tpu.matmul %66, %70, %cst_73 {dimension_numbers = #tpu.dot_dimension_numbers<[1], [0], [0], [1], [0, 0, 1, 1], [], []>} : vector<1x8xf32>, vector<8x128xf32>, vector<1x128xf32> -> vector<1x128xf32>
    %c0_74 = arith.constant 0 : index
    %c0_75 = arith.constant 0 : index
    %72 = vector.load %arg9[%c0_74, %c0_75] : memref<8x128xf32, #tpu.memory_space<vmem>>, vector<8x128xf32>
    %cst_76 = arith.constant dense<0.000000e+00> : vector<1x128xf32>
    %73 = tpu.matmul %69, %72, %cst_76 {dimension_numbers = #tpu.dot_dimension_numbers<[1], [0], [0], [1], [0, 0, 1, 1], [], []>} : vector<1x8xf32>, vector<8x128xf32>, vector<1x128xf32> -> vector<1x128xf32>
    %74 = vector.broadcast %71 : vector<1x128xf32> to vector<32x128xf32>
    %75 = arith.mulf %44, %74 : vector<32x128xf32>
    %76 = vector.broadcast %73 : vector<1x128xf32> to vector<32x128xf32>
    %77 = arith.addf %75, %76 : vector<32x128xf32>
    %cst_77 = arith.constant 0.000000e+00 : f32
    %78 = vector.broadcast %cst_77 : f32 to vector<32x128xf32>
    %79 = arith.maximumf %77, %78 : vector<32x128xf32>
    %cst_78 = arith.constant 0.000000e+00 : f32
    %80 = vector.broadcast %cst_78 : f32 to vector<2x1x128xf32>
    %c0_79 = arith.constant 0 : index
    %c0_80 = arith.constant 0 : index
    %c0_81 = arith.constant 0 : index
    %81 = vector.load %arg12[%c0_79, %c0_80, %c0_81] : memref<2x18x128xf32, #tpu.memory_space<vmem>>, vector<2x1x128xf32>
    tpu.vector_store %arg12[%c0_79, %c0_80, %c0_81], %80 {strides = array<i32>} : memref<2x18x128xf32, #tpu.memory_space<vmem>>, vector<2x1x128xf32>,
    %cst_82 = arith.constant 0.000000e+00 : f32
    %82 = vector.broadcast %cst_82 : f32 to vector<2x1x128xf32>
    %c0_83 = arith.constant 0 : index
    %c17_84 = arith.constant 17 : index
    %c0_85 = arith.constant 0 : index
    %83 = vector.load %arg12[%c0_83, %c17_84, %c0_85] : memref<2x18x128xf32, #tpu.memory_space<vmem>>, vector<2x1x128xf32>
    tpu.vector_store %arg12[%c0_83, %c17_84, %c0_85], %82 {strides = array<i32>} : memref<2x18x128xf32, #tpu.memory_space<vmem>>, vector<2x1x128xf32>,
    %84 = vector.shape_cast %79 : vector<32x128xf32> to vector<2x16x128xf32>
    %c0_86 = arith.constant 0 : index
    %c1_87 = arith.constant 1 : index
    %c0_88 = arith.constant 0 : index
    %85 = vector.load %arg12[%c0_86, %c1_87, %c0_88] : memref<2x18x128xf32, #tpu.memory_space<vmem>>, vector<2x16x128xf32>
    tpu.vector_store %arg12[%c0_86, %c1_87, %c0_88], %84 {strides = array<i32>} : memref<2x18x128xf32, #tpu.memory_space<vmem>>, vector<2x16x128xf32>,
    %cst_89 = arith.constant 0.000000e+00 : f32
    %86 = vector.broadcast %cst_89 : f32 to vector<16x128xf32>
    %c0_90 = arith.constant 0 : index
    %c0_91 = arith.constant 0 : index
    %c0_92 = arith.constant 0 : index
    %87 = vector.load %arg12[%c0_90, %c0_91, %c0_92] : memref<2x18x128xf32, #tpu.memory_space<vmem>>, vector<1x16x128xf32>
    %88 = vector.shape_cast %87 : vector<1x16x128xf32> to vector<16x128xf32>
    %c0_93 = arith.constant 0 : index
    %c0_94 = arith.constant 0 : index
    %c0_95 = arith.constant 0 : index
    %89 = vector.load %arg3[%c0_93, %c0_94, %c0_95] : memref<3x128x128xf32, #tpu.memory_space<vmem>>, vector<1x128x128xf32>
    %90 = vector.shape_cast %89 : vector<1x128x128xf32> to vector<128x128xf32>
    %cst_96 = arith.constant dense<0.000000e+00> : vector<16x128xf32>
    %91 = tpu.matmul %88, %90, %cst_96 {dimension_numbers = #tpu.dot_dimension_numbers<[1], [0], [0], [1], [0, 0, 1, 1], [], []>} : vector<16x128xf32>, vector<128x128xf32>, vector<16x128xf32> -> vector<16x128xf32>
    %92 = arith.addf %86, %91 : vector<16x128xf32>
    %c0_97 = arith.constant 0 : index
    %c1_98 = arith.constant 1 : index
    %c0_99 = arith.constant 0 : index
    %93 = vector.load %arg12[%c0_97, %c1_98, %c0_99] : memref<2x18x128xf32, #tpu.memory_space<vmem>>, vector<1x16x128xf32>
    %94 = vector.shape_cast %93 : vector<1x16x128xf32> to vector<16x128xf32>
    %c1_100 = arith.constant 1 : index
    %c0_101 = arith.constant 0 : index
    %c0_102 = arith.constant 0 : index
    %95 = vector.load %arg3[%c1_100, %c0_101, %c0_102] : memref<3x128x128xf32, #tpu.memory_space<vmem>>, vector<1x128x128xf32>
    %96 = vector.shape_cast %95 : vector<1x128x128xf32> to vector<128x128xf32>
    %cst_103 = arith.constant dense<0.000000e+00> : vector<16x128xf32>
    %97 = tpu.matmul %94, %96, %cst_103 {dimension_numbers = #tpu.dot_dimension_numbers<[1], [0], [0], [1], [0, 0, 1, 1], [], []>} : vector<16x128xf32>, vector<128x128xf32>, vector<16x128xf32> -> vector<16x128xf32>
    %98 = arith.addf %92, %97 : vector<16x128xf32>
    %c0_104 = arith.constant 0 : index
    %c2_105 = arith.constant 2 : index
    %c0_106 = arith.constant 0 : index
    %99 = vector.load %arg12[%c0_104, %c2_105, %c0_106] : memref<2x18x128xf32, #tpu.memory_space<vmem>>, vector<1x16x128xf32>
    %100 = vector.shape_cast %99 : vector<1x16x128xf32> to vector<16x128xf32>
    %c2_107 = arith.constant 2 : index
    %c0_108 = arith.constant 0 : index
    %c0_109 = arith.constant 0 : index
    %101 = vector.load %arg3[%c2_107, %c0_108, %c0_109] : memref<3x128x128xf32, #tpu.memory_space<vmem>>, vector<1x128x128xf32>
    %102 = vector.shape_cast %101 : vector<1x128x128xf32> to vector<128x128xf32>
    %cst_110 = arith.constant dense<0.000000e+00> : vector<16x128xf32>
    %103 = tpu.matmul %100, %102, %cst_110 {dimension_numbers = #tpu.dot_dimension_numbers<[1], [0], [0], [1], [0, 0, 1, 1], [], []>} : vector<16x128xf32>, vector<128x128xf32>, vector<16x128xf32> -> vector<16x128xf32>
    %104 = arith.addf %98, %103 : vector<16x128xf32>
    %cst_111 = arith.constant 0.000000e+00 : f32
    %105 = vector.broadcast %cst_111 : f32 to vector<16x128xf32>
    %c1_112 = arith.constant 1 : index
    %c0_113 = arith.constant 0 : index
    %c0_114 = arith.constant 0 : index
    %106 = vector.load %arg12[%c1_112, %c0_113, %c0_114] : memref<2x18x128xf32, #tpu.memory_space<vmem>>, vector<1x16x128xf32>
    %107 = vector.shape_cast %106 : vector<1x16x128xf32> to vector<16x128xf32>
    %c0_115 = arith.constant 0 : index
    %c0_116 = arith.constant 0 : index
    %c0_117 = arith.constant 0 : index
    %108 = vector.load %arg3[%c0_115, %c0_116, %c0_117] : memref<3x128x128xf32, #tpu.memory_space<vmem>>, vector<1x128x128xf32>
    %109 = vector.shape_cast %108 : vector<1x128x128xf32> to vector<128x128xf32>
    %cst_118 = arith.constant dense<0.000000e+00> : vector<16x128xf32>
    %110 = tpu.matmul %107, %109, %cst_118 {dimension_numbers = #tpu.dot_dimension_numbers<[1], [0], [0], [1], [0, 0, 1, 1], [], []>} : vector<16x128xf32>, vector<128x128xf32>, vector<16x128xf32> -> vector<16x128xf32>
    %111 = arith.addf %105, %110 : vector<16x128xf32>
    %c1_119 = arith.constant 1 : index
    %c1_120 = arith.constant 1 : index
    %c0_121 = arith.constant 0 : index
    %112 = vector.load %arg12[%c1_119, %c1_120, %c0_121] : memref<2x18x128xf32, #tpu.memory_space<vmem>>, vector<1x16x128xf32>
    %113 = vector.shape_cast %112 : vector<1x16x128xf32> to vector<16x128xf32>
    %c1_122 = arith.constant 1 : index
    %c0_123 = arith.constant 0 : index
    %c0_124 = arith.constant 0 : index
    %114 = vector.load %arg3[%c1_122, %c0_123, %c0_124] : memref<3x128x128xf32, #tpu.memory_space<vmem>>, vector<1x128x128xf32>
    %115 = vector.shape_cast %114 : vector<1x128x128xf32> to vector<128x128xf32>
    %cst_125 = arith.constant dense<0.000000e+00> : vector<16x128xf32>
    %116 = tpu.matmul %113, %115, %cst_125 {dimension_numbers = #tpu.dot_dimension_numbers<[1], [0], [0], [1], [0, 0, 1, 1], [], []>} : vector<16x128xf32>, vector<128x128xf32>, vector<16x128xf32> -> vector<16x128xf32>
    %117 = arith.addf %111, %116 : vector<16x128xf32>
    %c1_126 = arith.constant 1 : index
    %c2_127 = arith.constant 2 : index
    %c0_128 = arith.constant 0 : index
    %118 = vector.load %arg12[%c1_126, %c2_127, %c0_128] : memref<2x18x128xf32, #tpu.memory_space<vmem>>, vector<1x16x128xf32>
    %119 = vector.shape_cast %118 : vector<1x16x128xf32> to vector<16x128xf32>
    %c2_129 = arith.constant 2 : index
    %c0_130 = arith.constant 0 : index
    %c0_131 = arith.constant 0 : index
    %120 = vector.load %arg3[%c2_129, %c0_130, %c0_131] : memref<3x128x128xf32, #tpu.memory_space<vmem>>, vector<1x128x128xf32>
    %121 = vector.shape_cast %120 : vector<1x128x128xf32> to vector<128x128xf32>
    %cst_132 = arith.constant dense<0.000000e+00> : vector<16x128xf32>
    %122 = tpu.matmul %119, %121, %cst_132 {dimension_numbers = #tpu.dot_dimension_numbers<[1], [0], [0], [1], [0, 0, 1, 1], [], []>} : vector<16x128xf32>, vector<128x128xf32>, vector<16x128xf32> -> vector<16x128xf32>
    %123 = arith.addf %117, %122 : vector<16x128xf32>
    %124 = tpu.concatenate %104, %123 in 0 : vector<16x128xf32>, vector<16x128xf32> -> vector<32x128xf32>
    %c0_133 = arith.constant 0 : index
    %c0_134 = arith.constant 0 : index
    %125 = vector.load %arg8[%c0_133, %c0_134] : memref<128x8xf32, #tpu.memory_space<vmem>>, vector<128x8xf32>
    %cst_135 = arith.constant dense<0.000000e+00> : vector<32x8xf32>
    %126 = tpu.matmul %124, %125, %cst_135 {dimension_numbers = #tpu.dot_dimension_numbers<[1], [0], [0], [1], [0, 0, 1, 1], [], []>} : vector<32x128xf32>, vector<128x8xf32>, vector<32x8xf32> -> vector<32x8xf32>
    %cst_136 = arith.constant dense<0.000000e+00> : vector<8xf32>
    %127 = vector.multi_reduction <add>, %126, %cst_136 [0] : vector<32x8xf32> to vector<8xf32>
    %128 = vector.shape_cast %127 : vector<8xf32> to vector<1x8xf32>
    %cst_137 = arith.constant 0.001953125 : f32
    %129 = vector.broadcast %cst_137 : f32 to vector<1x8xf32>
    %130 = arith.mulf %128, %129 : vector<1x8xf32>
    %c0_138 = arith.constant 0 : index
    %c0_139 = arith.constant 0 : index
    %131 = vector.load %arg9[%c0_138, %c0_139] : memref<8x128xf32, #tpu.memory_space<vmem>>, vector<8x128xf32>
    %cst_140 = arith.constant dense<0.000000e+00> : vector<1x128xf32>
    %132 = tpu.matmul %130, %131, %cst_140 {dimension_numbers = #tpu.dot_dimension_numbers<[1], [0], [0], [1], [0, 0, 1, 1], [], []>} : vector<1x8xf32>, vector<8x128xf32>, vector<1x128xf32> -> vector<1x128xf32>
    %133 = vector.broadcast %132 : vector<1x128xf32> to vector<32x128xf32>
    %134 = arith.subf %124, %133 : vector<32x128xf32>
    %135 = arith.mulf %134, %134 : vector<32x128xf32>
    %c0_141 = arith.constant 0 : index
    %c0_142 = arith.constant 0 : index
    %136 = vector.load %arg8[%c0_141, %c0_142] : memref<128x8xf32, #tpu.memory_space<vmem>>, vector<128x8xf32>
    %cst_143 = arith.constant dense<0.000000e+00> : vector<32x8xf32>
    %137 = tpu.matmul %135, %136, %cst_143 {dimension_numbers = #tpu.dot_dimension_numbers<[1], [0], [0], [1], [0, 0, 1, 1], [], []>} : vector<32x128xf32>, vector<128x8xf32>, vector<32x8xf32> -> vector<32x8xf32>
    %cst_144 = arith.constant dense<0.000000e+00> : vector<8xf32>
    %138 = vector.multi_reduction <add>, %137, %cst_144 [0] : vector<32x8xf32> to vector<8xf32>
    %139 = vector.shape_cast %138 : vector<8xf32> to vector<1x8xf32>
    %cst_145 = arith.constant 0.001953125 : f32
    %140 = vector.broadcast %cst_145 : f32 to vector<1x8xf32>
    %141 = arith.mulf %139, %140 : vector<1x8xf32>
    %c0_146 = arith.constant 0 : index
    %c0_147 = arith.constant 0 : index
    %142 = vector.load %arg6[%c0_146, %c0_147] : memref<1x8xf32, #tpu.memory_space<vmem>>, vector<1x8xf32>
    %cst_148 = arith.constant 9.99999974E-6 : f32
    %143 = vector.broadcast %cst_148 : f32 to vector<1x8xf32>
    %144 = arith.addf %141, %143 : vector<1x8xf32>
    %145 = math.rsqrt %144 : vector<1x8xf32>
    %146 = arith.mulf %142, %145 : vector<1x8xf32>
    %c0_149 = arith.constant 0 : index
    %c0_150 = arith.constant 0 : index
    %147 = vector.load %arg7[%c0_149, %c0_150] : memref<1x8xf32, #tpu.memory_space<vmem>>, vector<1x8xf32>
    %148 = arith.mulf %130, %146 : vector<1x8xf32>
    %149 = arith.subf %147, %148 : vector<1x8xf32>
    %c0_151 = arith.constant 0 : index
    %c0_152 = arith.constant 0 : index
    %150 = vector.load %arg9[%c0_151, %c0_152] : memref<8x128xf32, #tpu.memory_space<vmem>>, vector<8x128xf32>
    %cst_153 = arith.constant dense<0.000000e+00> : vector<1x128xf32>
    %151 = tpu.matmul %146, %150, %cst_153 {dimension_numbers = #tpu.dot_dimension_numbers<[1], [0], [0], [1], [0, 0, 1, 1], [], []>} : vector<1x8xf32>, vector<8x128xf32>, vector<1x128xf32> -> vector<1x128xf32>
    %c0_154 = arith.constant 0 : index
    %c0_155 = arith.constant 0 : index
    %152 = vector.load %arg9[%c0_154, %c0_155] : memref<8x128xf32, #tpu.memory_space<vmem>>, vector<8x128xf32>
    %cst_156 = arith.constant dense<0.000000e+00> : vector<1x128xf32>
    %153 = tpu.matmul %149, %152, %cst_156 {dimension_numbers = #tpu.dot_dimension_numbers<[1], [0], [0], [1], [0, 0, 1, 1], [], []>} : vector<1x8xf32>, vector<8x128xf32>, vector<1x128xf32> -> vector<1x128xf32>
    %154 = vector.broadcast %151 : vector<1x128xf32> to vector<32x128xf32>
    %155 = arith.mulf %124, %154 : vector<32x128xf32>
    %156 = vector.broadcast %153 : vector<1x128xf32> to vector<32x128xf32>
    %157 = arith.addf %155, %156 : vector<32x128xf32>
    %cst_157 = arith.constant 0.000000e+00 : f32
    %158 = vector.broadcast %cst_157 : f32 to vector<32x128xf32>
    %159 = arith.maximumf %157, %158 : vector<32x128xf32>
    %160 = vector.shape_cast %159 : vector<32x128xf32> to vector<2x16x128xf32>
    %c0_158 = arith.constant 0 : index
    %c0_159 = arith.constant 0 : index
    %c0_160 = arith.constant 0 : index
    %161 = vector.load %arg10[%c0_158, %c0_159, %c0_160] : memref<2x16x128xf32, #tpu.memory_space<vmem>>, vector<2x16x128xf32>
    tpu.vector_store %arg10[%c0_158, %c0_159, %c0_160], %160 {strides = array<i32>} : memref<2x16x128xf32, #tpu.memory_space<vmem>>, vector<2x16x128xf32>,
    return
  }
  func.func @transform_0(%arg0: i32) -> (i32, i32, i32) {
    %c0_i32 = arith.constant 0 : i32
    %c0_i32_0 = arith.constant 0 : i32
    %c0_i32_1 = arith.constant 0 : i32
    %c0_i32_2 = arith.constant 0 : i32
    return %c0_i32, %c0_i32_0, %c0_i32_1 : i32, i32, i32
  }
  func.func @transform_1(%arg0: i32) -> (i32, i32, i32) {
    %c0_i32 = arith.constant 0 : i32
    %c0_i32_0 = arith.constant 0 : i32
    %c0_i32_1 = arith.constant 0 : i32
    %c0_i32_2 = arith.constant 0 : i32
    return %c0_i32, %c0_i32_0, %c0_i32_1 : i32, i32, i32
  }
  func.func @transform_2(%arg0: i32) -> (i32, i32, i32) {
    %c0_i32 = arith.constant 0 : i32
    %c0_i32_0 = arith.constant 0 : i32
    %c0_i32_1 = arith.constant 0 : i32
    %c0_i32_2 = arith.constant 0 : i32
    return %c0_i32, %c0_i32_0, %c0_i32_1 : i32, i32, i32
  }
  func.func @transform_3(%arg0: i32) -> (i32, i32) {
    %c0_i32 = arith.constant 0 : i32
    %c0_i32_0 = arith.constant 0 : i32
    %c0_i32_1 = arith.constant 0 : i32
    return %c0_i32, %c0_i32_0 : i32, i32
  }
  func.func @transform_4(%arg0: i32) -> (i32, i32) {
    %c0_i32 = arith.constant 0 : i32
    %c0_i32_0 = arith.constant 0 : i32
    %c0_i32_1 = arith.constant 0 : i32
    return %c0_i32, %c0_i32_0 : i32, i32
  }
  func.func @transform_5(%arg0: i32) -> (i32, i32) {
    %c0_i32 = arith.constant 0 : i32
    %c0_i32_0 = arith.constant 0 : i32
    %c0_i32_1 = arith.constant 0 : i32
    return %c0_i32, %c0_i32_0 : i32, i32
  }
  func.func @transform_6(%arg0: i32) -> (i32, i32) {
    %c0_i32 = arith.constant 0 : i32
    %c0_i32_0 = arith.constant 0 : i32
    %c0_i32_1 = arith.constant 0 : i32
    return %c0_i32, %c0_i32_0 : i32, i32
  }
  func.func @transform_7(%arg0: i32) -> (i32, i32) {
    %c0_i32 = arith.constant 0 : i32
    %c0_i32_0 = arith.constant 0 : i32
    %c0_i32_1 = arith.constant 0 : i32
    return %c0_i32, %c0_i32_0 : i32, i32
  }
  func.func @transform_8(%arg0: i32) -> (i32, i32) {
    %c0_i32 = arith.constant 0 : i32
    %c0_i32_0 = arith.constant 0 : i32
    %c0_i32_1 = arith.constant 0 : i32
    return %c0_i32, %c0_i32_0 : i32, i32
  }
  func.func @transform_9(%arg0: i32) -> (i32, i32, i32) {
    %c0_i32 = arith.constant 0 : i32
    %c0_i32_0 = arith.constant 0 : i32
    %c0_i32_1 = arith.constant 0 : i32
    %c0_i32_2 = arith.constant 0 : i32
    return %c0_i32, %c0_i32_0, %c0_i32_1 : i32, i32, i32
  }
}

</mosaic_0001>

<bundles_post_ra>
// kernel: downconv_forward.1
= control target key start
LH: loop header
LB: loop body
LE: loop exit
PB: predicated region body
PF: predicated region fallthrough
CT: control target
= control target key end

     0   :  { %vm32_vm0 = vcmask 516096   ;;  %v3961_v3 = vmov 0.0   ;;  %vm41_vm1 = vcmask 523264   ;;  %vm2911_vm2 = vmmov 0   ;;  %s3951_s1 = inlined_call_operand.vmem [shape: f32[3,64,128], index: 1, kind: input, shape index: {}]   ;;  %s3952_s0 = inlined_call_operand.vmem [shape: f32[2,16,64], index: 0, kind: input, shape index: {}]   ;;  %s3953_s7 = inlined_call_operand.vmem [shape: f32[128,8], index: 7, kind: input, shape index: {}]   ;;  %s3954_s8 = inlined_call_operand.vmem [shape: f32[8,128], index: 8, kind: input, shape index: {}]   ;;  %s3955_s2 = inlined_call_operand.vmem [shape: f32[3,128,128], index: 2, kind: input, shape index: {}]   ;;  %s3956_s3 = inlined_call_operand.vmem [shape: f32[1,8], index: 3, kind: input, shape index: {}]   ;;  %s3957_s4 = inlined_call_operand.vmem [shape: f32[1,8], index: 4, kind: input, shape index: {}]   ;;  %s3958_s5 = inlined_call_operand.vmem [shape: f32[1,8], index: 5, kind: input, shape index: {}]   ;;  %s3959_s6 = inlined_call_operand.vmem [shape: f32[1,8], index: 6, kind: input, shape index: {}]   ;;  %s3960_s9 = inlined_call_operand.vmem [shape: f32[2,16,128], index: 9, kind: output, shape index: {}]  }
   0x1   :  { %v2965_v0 = vld [vmem:[%s3951_s1 + $0x78] sm:$0xff]  ;;  %v2975_v2 = vld [vmem:[%s3951_s1 + $0x70] sm:$0xff]  ;;  %33 = vst.msk [vmem:[#allocation2] sm:$0x1] %vm32_vm0, %v3961_v3  ;;  %34 = vst.msk [vmem:[#allocation2 + $0x18] sm:$0x1] %vm32_vm0, %v3961_v3 }
   0x2   :  { %v2970_v1 = vld [vmem:[%s3951_s1 + $0x38] sm:$0xff]  ;;  %35 = vst.msk [vmem:[#allocation2 + $0x11] sm:$0x1] %vm32_vm0, %v3961_v3  ;;  %36 = vst.msk [vmem:[#allocation2 + $0x29] sm:$0x1] %vm32_vm0, %v3961_v3  ;;  %2381 = vmatprep.subr.mxu0 %v2965_v0  ;;  %v2990_v4 = vld [vmem:[%s3951_s1 + $0x30] sm:$0xff] }
   0x3   :  { %1049 = vst [vmem:[#allocation3] sm:$0x1] %v3961_v3  ;;  %1050 = vst [vmem:[#allocation3 + $0x18] sm:$0x1] %v3961_v3  ;;  %2400 = vmatprep.subr.mxu1 %v2970_v1  ;;  %2382 = vmatpush3.msra.mxu0 %v2965_v0  ;;  %v2997_v5 = vld [vmem:[%s3951_s1 + $0x68] sm:$0xff]  ;;  %v3011_v7 = vld [vmem:[%s3951_s1 + $0x60] sm:$0xff] }
   0x4   :  { %1051 = vst [vmem:[#allocation3 + $0x11] sm:$0x1] %v3961_v3  ;;  %1052 = vst [vmem:[#allocation3 + $0x29] sm:$0x1] %v3961_v3  ;;  %2401 = vmatpush3.msra.mxu1 %v2970_v1  ;;  %v3002_v6 = vld [vmem:[%s3951_s1 + $0x28] sm:$0xff]  ;;  %2383 = vmatprep.subr.mxu0 %v2975_v2  ;;  %v3016_v8 = vld [vmem:[%s3951_s1 + $0x20] sm:$0xff] }
   0x5   :  { %2402 = vmatprep.subr.mxu1 %v2990_v4  ;;  %2384 = vmatpush3.msra.mxu0 %v2975_v2  ;;  %v37_v9 = vld [vmem:[%s3952_s0] sm:$0xff]  ;;  %v38_v10 = vld [vmem:[%s3952_s0 + $0x8] sm:$0xff]  ;;  %v3031_v11 = vld [vmem:[%s3951_s1 + $0x58] sm:$0xff]  ;;  %vm676_vm3 = vcmask 64512  }
   0x6   :  { %2403 = vmatpush3.msra.mxu1 %v2990_v4  ;;  %2385 = vmatprep.subr.mxu0 %v2997_v5  ;;  %v3036_v12 = vld [vmem:[%s3951_s1 + $0x18] sm:$0xff]  ;;  %42 = vst.msk [vmem:[#allocation2 + $0x1] sm:$0xff] %vm41_vm1, %v37_v9  ;;  %43 = vst.msk [vmem:[#allocation2 + $0x9] sm:$0xff] %vm41_vm1, %v38_v10  ;;  %v3047_v13 = vld [vmem:[%s3951_s1 + $0x50] sm:$0xff] }
   0x7   :  { %2404 = vmatprep.subr.mxu1 %v3002_v6  ;;  %2386 = vmatpush3.msra.mxu0 %v2997_v5  ;;  %v3052_v14 = vld [vmem:[%s3951_s1 + $0x10] sm:$0xff]  ;;  %v40_v16 = vld [vmem:[%s3952_s0 + $0x18] sm:$0xff]  ;;  %v2056_v17 = vld [vmem:[%s3951_s1 + $0x48] sm:$0xff] }
   0x8   :  { %2405 = vmatpush3.msra.mxu1 %v3002_v6  ;;  %2387 = vmatprep.subr.mxu0 %v3011_v7  ;;  %v39_v15 = vld [vmem:[%s3952_s0 + $0x10] sm:$0xff]  ;;  %v3071_v18 = vld [vmem:[%s3951_s1 + $0x8] sm:$0xff]  ;;  %45 = vst.msk [vmem:[#allocation2 + $0x21] sm:$0xff] %vm41_vm1, %v40_v16  ;;  %v2055_v19 = vld [vmem:[%s3951_s1 + $0x40] sm:$0xff] }
   0x9   :  { %2406 = vmatprep.subr.mxu1 %v3016_v8  ;;  %2388 = vmatpush3.msra.mxu0 %v3011_v7  ;;  %44 = vst.msk [vmem:[#allocation2 + $0x19] sm:$0xff] %vm41_vm1, %v39_v15  ;;  %v3084_v20 = vld [vmem:[%s3951_s1] sm:$0xff]  ;;  %v2074_v25 = vld [vmem:[%s3951_s1 + $0xb8] sm:$0xff]  ;;  %v2073_v26 = vld [vmem:[%s3951_s1 + $0xb0] sm:$0xff] }
   0xa   :  { %2407 = vmatpush3.msra.mxu1 %v3016_v8  ;;  %2389 = vmatprep.subr.mxu0 %v3031_v11  ;;  %v2072_v27 = vld [vmem:[%s3951_s1 + $0xa8] sm:$0xff]  ;;  %v2071_v28 = vld [vmem:[%s3951_s1 + $0xa0] sm:$0xff]  ;;  %v2070_v29 = vld [vmem:[%s3951_s1 + $0x98] sm:$0xff] }
   0xb   :  { %2408 = vmatprep.subr.mxu1 %v3036_v12  ;;  %2390 = vmatpush3.msra.mxu0 %v3031_v11  ;;  %v2069_v30 = vld [vmem:[%s3951_s1 + $0x90] sm:$0xff]  ;;  %v2068_v31 = vld [vmem:[%s3951_s1 + $0x88] sm:$0xff]  ;;  %v2067_v32 = vld [vmem:[%s3951_s1 + $0x80] sm:$0xff] }
   0xc   :  { %2409 = vmatpush3.msra.mxu1 %v3036_v12  ;;  %2391 = vmatprep.subr.mxu0 %v3047_v13  ;;  %v3154_v41 = vld [vmem:[%s3953_s7 + $0x78] sm:$0xff]  ;;  %v3162_v42 = vld [vmem:[%s3953_s7 + $0x70] sm:$0xff]  ;;  %v3170_v43 = vld [vmem:[%s3953_s7 + $0x68] sm:$0xff] }
   0xd   :  { %2410 = vmatprep.subr.mxu1 %v3052_v14  ;;  %2392 = vmatpush3.msra.mxu0 %v3047_v13  ;;  %v56_v21 = vld [vmem:[#allocation2 + $0x1] sm:$0xff]  ;;  %v57_v23 = vld [vmem:[#allocation2 + $0x9] sm:$0xff]  ;;  %v3184_v45 = vld [vmem:[%s3953_s7 + $0x58] sm:$0xff] }
   0xe   :  { %2411 = vmatpush3.msra.mxu1 %v3052_v14  ;;  %2393 = vmatprep.subr.mxu0 %v2056_v17  ;;  %v46_v22 = vld [vmem:[#allocation2] sm:$0xff]  ;;  %v47_v24 = vld [vmem:[#allocation2 + $0x8] sm:$0xff]  ;;  %v3193_v46 = vld [vmem:[%s3953_s7 + $0x50] sm:$0xff] }
   0xf   :  { %2412 = vmatprep.subr.mxu1 %v3071_v18  ;;  %2394 = vmatpush3.msra.mxu0 %v2056_v17  ;;  %v229_v33 = vld [vmem:[#allocation2 + $0x2] sm:$0xff]  ;;  %v230_v34 = vld [vmem:[#allocation2 + $0xa] sm:$0xff]  ;;  %v3212_v49 = vld [vmem:[%s3953_s7 + $0x38] sm:$0xff] }
  0x10   :  { %2413 = vmatpush3.msra.mxu1 %v3071_v18  ;;  %2395 = vmatprep.subr.mxu0 %v2055_v19  ;;  %v326_v35 = vld [vmem:[#allocation2 + $0x19] sm:$0xff]  ;;  %v327_v36 = vld [vmem:[#allocation2 + $0x21] sm:$0xff]  ;;  %v3219_v50 = vld [vmem:[%s3953_s7 + $0x30] sm:$0xff] }
  0x11   :  { %2414 = vmatprep.subr.mxu1 %v3084_v20  ;;  %2396 = vmatpush3.msra.mxu0 %v2055_v19  ;;  %v324_v37 = vld [vmem:[#allocation2 + $0x18] sm:$0xff]  ;;  %v325_v39 = vld [vmem:[#allocation2 + $0x20] sm:$0xff]  ;;  %v3200_v47 = vld [vmem:[%s3953_s7 + $0x48] sm:$0xff] }
  0x12   :  { %2397 = vmatprep.mubr.msk.f32.mxu0 %vm41_vm1, %v56_v21  ;;  %2415 = vmatpush3.msra.mxu1 %v3084_v20  ;;  %v490_v38 = vld [vmem:[#allocation2 + $0x1a] sm:$0xff]  ;;  %v491_v40 = vld [vmem:[#allocation2 + $0x22] sm:$0xff]  ;;  %v3249_v54 = vld [vmem:[%s3953_s7 + $0x10] sm:$0xff] }
  0x13   :  { %2416 = vmatprep.mubr.msk.f32.mxu1 %vm41_vm1, %v46_v22  ;;  %2398 = vmatmul.mubr.msk.f32.vlgmr.msra.gmra.mxu0 %vm41_vm1, %v57_v23  ;;  %v3177_v44 = vld [vmem:[%s3953_s7 + $0x60] sm:$0xff]  ;;  %v3226_v51 = vld [vmem:[%s3953_s7 + $0x28] sm:$0xff]  ;;  %v3240_v53 = vld [vmem:[%s3953_s7 + $0x18] sm:$0xff]  ;;  %3978 = vst [vmem:[#allocation7_spill] sm:$0xff] %v3249_v54 }
  0x14   :  { %2417 = vmatmul.mubr.msk.f32.vlgmr.msra.gmra.mxu1 %vm41_vm1, %v47_v24  ;;  %2419 = vmatprep.subr.mxu0 %v2074_v25  ;;  %v3205_v48 = vld [vmem:[%s3953_s7 + $0x40] sm:$0xff]  ;;  %3975 = vst [vmem:[#allocation4_spill] sm:$0xff] %v3226_v51  ;;  %3977 = vst [vmem:[#allocation6_spill] sm:$0xff] %v3240_v53  ;;  %v3256_v55 = vld [vmem:[%s3953_s7 + $0x8] sm:$0xff] }
  0x15   :  { %2438 = vmatprep.subr.mxu1 %v2965_v0  ;;  %2420 = vmatpush3.msra.mxu0 %v2074_v25  ;;  %v3233_v52 = vld [vmem:[%s3953_s7 + $0x20] sm:$0xff]  ;;  %3979 = vst [vmem:[#allocation8_spill] sm:$0xff] %v3256_v55 }
  0x16   :  { %2439 = vmatpush3.msra.mxu1 %v2965_v0  ;;  %2421 = vmatprep.subr.mxu0 %v2073_v26  ;;  %3976 = vst [vmem:[#allocation5_spill] sm:$0xff] %v3233_v52  ;;  %v3262_v56 = vld [vmem:[%s3953_s7] sm:$0xff] }
  0x17   :  { %2440 = vmatprep.subr.mxu1 %v2975_v2  ;;  %2422 = vmatpush3.msra.mxu0 %v2073_v26  ;;  %3980 = vst [vmem:[#allocation9_spill] sm:$0xff] %v3262_v56 }
  0x18   :  { %2441 = vmatpush3.msra.mxu1 %v2975_v2  ;;  %2423 = vmatprep.subr.mxu0 %v2072_v27 }
  0x19   :  { %2442 = vmatprep.subr.mxu1 %v2997_v5  ;;  %2424 = vmatpush3.msra.mxu0 %v2072_v27 }
  0x1a   :  { %2443 = vmatpush3.msra.mxu1 %v2997_v5  ;;  %2425 = vmatprep.subr.mxu0 %v2071_v28 }
  0x1b   :  { %2444 = vmatprep.subr.mxu1 %v3011_v7  ;;  %2426 = vmatpush3.msra.mxu0 %v2071_v28 }
  0x1c   :  { %2445 = vmatpush3.msra.mxu1 %v3011_v7  ;;  %2427 = vmatprep.subr.mxu0 %v2070_v29 }
  0x1d   :  { %2446 = vmatprep.subr.mxu1 %v3031_v11  ;;  %2428 = vmatpush3.msra.mxu0 %v2070_v29 }
  0x1e   :  { %2447 = vmatpush3.msra.mxu1 %v3031_v11  ;;  %2429 = vmatprep.subr.mxu0 %v2069_v30 }
  0x1f   :  { %2448 = vmatprep.subr.mxu1 %v3047_v13  ;;  %2430 = vmatpush3.msra.mxu0 %v2069_v30 }
  0x20   :  { %2449 = vmatpush3.msra.mxu1 %v3047_v13  ;;  %2431 = vmatprep.subr.mxu0 %v2068_v31 }
  0x21   :  { %2450 = vmatprep.subr.mxu1 %v2056_v17  ;;  %2432 = vmatpush3.msra.mxu0 %v2068_v31 }
  0x22   :  { %2451 = vmatpush3.msra.mxu1 %v2056_v17  ;;  %2433 = vmatprep.subr.mxu0 %v2067_v32 }
  0x23   :  { %2452 = vmatprep.subr.mxu1 %v2055_v19  ;;  %2434 = vmatpush3.msra.mxu0 %v2067_v32 }
  0x24   :  { %2435 = vmatprep.mubr.msk.f32.mxu0 %vm41_vm1, %v229_v33  ;;  %2453 = vmatpush3.msra.mxu1 %v2055_v19  ;;  %v765_v33 = vlaneseq }
  0x25   :  { %2436 = vmatmul.mubr.msk.f32.vlgmr.msra.gmra.mxu0 %vm41_vm1, %v230_v34  ;;  %2454 = vmatprep.mubr.msk.f32.mxu1 %vm41_vm1, %v326_v35 }
  0x26   :  { %2457 = vmatprep.subr.mxu0 %v2970_v1  ;;  %2476 = vmatprep.subr.mxu1 %v2074_v25  ;;  %v766_v34 = vshrl.u32 %v765_v33, 7 }
  0x27   :  { %2455 = vmatmul.mubr.msk.f32.vlgmr.msra.gmra.mxu1 %vm41_vm1, %v327_v36  ;;  %2458 = vmatpush3.msra.mxu0 %v2970_v1 }
  0x28   :  { %2477 = vmatpush3.msra.mxu1 %v2074_v25  ;;  %2459 = vmatprep.subr.mxu0 %v2990_v4  ;;  %v3332_v35 = vsub.s32 0, %v766_v34 }
  0x29   :  { %2478 = vmatprep.subr.mxu1 %v2073_v26  ;;  %2460 = vmatpush3.msra.mxu0 %v2990_v4 }
  0x2a   :  { %2479 = vmatpush3.msra.mxu1 %v2073_v26  ;;  %2461 = vmatprep.subr.mxu0 %v3002_v6 }
  0x2b   :  { %2480 = vmatprep.subr.mxu1 %v2072_v27  ;;  %2462 = vmatpush3.msra.mxu0 %v3002_v6 }
  0x2c   :  { %2481 = vmatpush3.msra.mxu1 %v2072_v27  ;;  %2463 = vmatprep.subr.mxu0 %v3016_v8 }
  0x2d   :  { %2482 = vmatprep.subr.mxu1 %v2071_v28  ;;  %2464 = vmatpush3.msra.mxu0 %v3016_v8 }
  0x2e   :  { %2483 = vmatpush3.msra.mxu1 %v2071_v28  ;;  %2465 = vmatprep.subr.mxu0 %v3036_v12 }
  0x2f   :  { %2484 = vmatprep.subr.mxu1 %v2070_v29  ;;  %2466 = vmatpush3.msra.mxu0 %v3036_v12 }
  0x30   :  { %2485 = vmatpush3.msra.mxu1 %v2070_v29  ;;  %2467 = vmatprep.subr.mxu0 %v3052_v14 }
  0x31   :  { %2486 = vmatprep.subr.mxu1 %v2069_v30  ;;  %2468 = vmatpush3.msra.mxu0 %v3052_v14  ;;  %v3283_v14 = vld [vmem:[%s3954_s8] sm:$0xff] }
  0x32   :  { %2487 = vmatpush3.msra.mxu1 %v2069_v30  ;;  %2469 = vmatprep.subr.mxu0 %v3071_v18 }
  0x33   :  { %2488 = vmatprep.subr.mxu1 %v2068_v31  ;;  %2470 = vmatpush3.msra.mxu0 %v3071_v18 }
  0x34   :  { %2489 = vmatpush3.msra.mxu1 %v2068_v31  ;;  %2471 = vmatprep.subr.mxu0 %v3084_v20 }
  0x35   :  { %2490 = vmatprep.subr.mxu1 %v2067_v32  ;;  %2472 = vmatpush3.msra.mxu0 %v3084_v20 }
  0x36   :  { %2473 = vmatprep.mubr.msk.f32.mxu0 %vm41_vm1, %v324_v37  ;;  %2491 = vmatpush3.msra.mxu1 %v2067_v32 }
  0x37   :  { %2492 = vmatprep.mubr.msk.f32.mxu1 %vm41_vm1, %v490_v38  ;;  %2474 = vmatmul.mubr.msk.f32.vlgmr.msra.gmra.mxu0 %vm41_vm1, %v325_v39 }
  0x38   :  { %2493 = vmatmul.mubr.msk.f32.vlgmr.msra.gmra.mxu1 %vm41_vm1, %v491_v40  ;;  %2495 = vmatprep.subr.mxu0 %v3154_v41 }
  0x39   :  { %2533 = vmatprep.subr.mxu1 %v3961_v3  ;;  %2496 = vmatpush3.msra.mxu0 %v3154_v41 }
  0x3a   :  { %2497 = vmatprep.subr.mxu0 %v3162_v42  ;;  %2534 = vmatpush3.msra.mxu1 %v3283_v14 }
  0x3b   :  { %2498 = vmatpush3.msra.mxu0 %v3162_v42  ;;  %2535 = vmatprep.mubr.msk.f32.mxu1 %vm2911_vm2, %v3961_v3 }
  0x3c   :  { %2499 = vmatprep.subr.mxu0 %v3170_v43  ;;  %2538 = vmatprep.subr.mxu1 %v3154_v41 }
  0x3d   :  { %2500 = vmatpush3.msra.mxu0 %v3170_v43 }
  0x3e   :  { %2501 = vmatprep.subr.mxu0 %v3177_v44 }
  0x3f   :  { %2502 = vmatpush3.msra.mxu0 %v3177_v44 }
  0x40   :  { %2503 = vmatprep.subr.mxu0 %v3184_v45 }
  0x41   :  { %2504 = vmatpush3.msra.mxu0 %v3184_v45 }
  0x42   :  { %2505 = vmatprep.subr.mxu0 %v3193_v46 }
  0x43   :  { %2506 = vmatpush3.msra.mxu0 %v3193_v46 }
  0x44   :  { %2507 = vmatprep.subr.mxu0 %v3200_v47 }
  0x45   :  { %2508 = vmatpush3.msra.mxu0 %v3200_v47 }
  0x46   :  { %2509 = vmatprep.subr.mxu0 %v3205_v48 }
  0x47   :  { %2510 = vmatpush3.msra.mxu0 %v3205_v48 }
  0x48   :  { %2511 = vmatprep.subr.mxu0 %v3212_v49 }
  0x49   :  { %2512 = vmatpush3.msra.mxu0 %v3212_v49 }
  0x4a   :  { %2513 = vmatprep.subr.mxu0 %v3219_v50 }
  0x4b   :  { %2514 = vmatpush3.msra.mxu0 %v3219_v50 }
  0x4c   :  { %2515 = vmatprep.subr.mxu0 %v3226_v51 }
  0x4d   :  { %2516 = vmatpush3.msra.mxu0 %v3226_v51 }
  0x4e   :  { %2517 = vmatprep.subr.mxu0 %v3233_v52 }
  0x4f   :  { %2518 = vmatpush3.msra.mxu0 %v3233_v52 }
  0x50   :  { %2519 = vmatprep.subr.mxu0 %v3240_v53 }
  0x51   :  { %2520 = vmatpush3.msra.mxu0 %v3240_v53 }
  0x52   :  { %2521 = vmatprep.subr.mxu0 %v3249_v54 }
  0x53   :  { %2522 = vmatpush3.msra.mxu0 %v3249_v54 }
  0x54   :  { %2523 = vmatprep.subr.mxu0 %v3256_v55 }
  0x55   :  { %2524 = vmatpush3.msra.mxu0 %v3256_v55 }
  0x56   :  { %2525 = vmatprep.subr.mxu0 %v3262_v56 }
  0x57   :  { %2526 = vmatpush3.msra.mxu0 %v3262_v56 }
  0x58   :  { %2576 = vmatprep.subr.mxu0 %v3961_v3 }
  0xd3   :  { %v2399_v57 = vpop.f32.mrf.mxu0 }
  0xd4   :  { %v2418_v58 = vpop.f32.mrf.mxu1 }
  0xd5   :  { %v139_v59 = vpop.f32.mrf.mxu0  ;;  %v226_v63 = vadd.f32 %v2418_v58, %v2399_v57 }
  0xd6   :  { %v220_v60 = vpop.f32.mrf.mxu1 }
  0xd7   :  { %v221_v62 = vadd.f32 %v220_v60, %v139_v59 }
  0xe5   :  { %v2437_v61 = vpop.f32.mrf.mxu0 }
  0xe6   :  { %v3270_v2 = vadd.f32 %v2437_v61, %v226_v63  ;;  %v3342_v63 = vld [vmem:[%s3955_s2 + $0xf8] sm:$0xff] }
  0xe7   :  { %v312_v0 = vpop.f32.mrf.mxu0  ;;  %v2456_v4 = vpop.f32.mrf.mxu1 }
  0xe8   :  { %v3268_v1 = vadd.f32 %v312_v0, %v221_v62  ;;  %v3347_v0 = vld [vmem:[%s3955_s2 + $0xf0] sm:$0xff] }
  0xe9   :  { %v400_v5 = vpop.f32.mrf.mxu1 }
  0xea   :  { %2527 = vmatprep.mubr.f32.mxu0 %v3268_v1 }
  0xeb   :  { %2528 = vmatmul.mubr.f32.vlgmr.msra.gmra.mxu0 %v3270_v2 }
  0xec   :  { %2577 = vmatpush3.msra.mxu0 %v3283_v14 }
  0xed   :  { %2581 = vmatprep.subr.mxu0 %v3961_v3 }
  0xf7   :  { %v2475_v6 = vpop.f32.mrf.mxu0 }
  0xf8   :  { %v2494_v7 = vpop.f32.mrf.mxu1  ;;  %v487_v8 = vadd.f32 %v2475_v6, %v2456_v4  ;;  %v3354_v4 = vld [vmem:[%s3955_s2 + $0xe8] sm:$0xff]  ;;  %v3368_v6 = vld [vmem:[%s3955_s2 + $0xd8] sm:$0xff] }
  0xf9   :  { %v481_v9 = vpop.f32.mrf.mxu0 }
  0xfa   :  { %v482_v10 = vadd.f32 %v481_v9, %v400_v5  ;;  %v564_v11 = vpop.f32.mrf.mxu1  ;;  %v3276_v13 = vadd.f32 %v2494_v7, %v487_v8  ;;  %v3361_v5 = vld [vmem:[%s3955_s2 + $0xe0] sm:$0xff]  ;;  %v3375_v7 = vld [vmem:[%s3955_s2 + $0xd0] sm:$0xff]  ;;  %v3382_v8 = vld [vmem:[%s3955_s2 + $0xc8] sm:$0xff] }
  0xfc   :  { %v3274_v12 = vadd.f32 %v564_v11, %v482_v10 }
  0xfe   :  { %2530 = vmatprep.mubr.f32.mxu0 %v3274_v12 }
  0xff   :  { %2531 = vmatmul.mubr.f32.gmra.mxu0 %v3276_v13 }
 0x100   :  { %2578 = vmatprep.mubr.msk.f32.mxu0 %vm2911_vm2, %v3961_v3 }
 0x1ab   :  { %v2529_v15 = vpop.f32.mrf.mxu0 }
 0x1ac   :  { %v678_v19 = vsel %vm676_vm3, %v2529_v15, 0.0 }
 0x1ad   :  { %v657_v16 = vpop.f32.mrf.mxu0 }
 0x1ae   :  { %v677_v17 = vsel %vm676_vm3, %v657_v16, 0.0 }
 0x1af   :  { %v679_v20 = vadd.f32 %v678_v19, %v677_v17 }
 0x1bf   :  { %v2532_v18 = vpop.f32.mrf.mxu0 }
 0x1c0   :  { %v682_v24 = vsel %vm676_vm3, %v2532_v18, 0.0 }
 0x1c1   :  { %v667_v21 = vpop.f32.mrf.mxu0 }
 0x1c2   :  { %v680_v22 = vsel %vm676_vm3, %v667_v21, 0.0 }
 0x1c3   :  { %v681_v23 = vadd.f32 %v680_v22, %v679_v20 }
 0x1c5   :  { %v683_v25 = vadd.f32 %v682_v24, %v681_v23 }
 0x1c7   :  { %v684_v26 = vrot.slane %v683_v25, 4 }
 0x1c9   :  { %v685_v27 = vadd.f32 %v684_v26, %v683_v25 }
 0x1cb   :  { %v686_v28 = vrot.slane %v685_v27, 2 }
 0x1cd   :  { %v687_v29 = vadd.f32 %v686_v28, %v685_v27 }
 0x1cf   :  { %v688_v30 = vrot.slane %v687_v29, 1 }
 0x1d1   :  { %v689_v31 = vadd.f32 %v688_v30, %v687_v29 }
 0x1d3   :  { %v3297_v32 = vmul.f32 0.001953125, %v689_v31  ;;  %v876_v31 = vld [vmem:[%s3956_s3] sm:$0x1] }
 0x1d5   :  { %2536 = vmatmul.mubr.msk.f32.vlgmr.msra.gmra.mxu1 %vm676_vm3, %v3297_v32 }
 0x1d6   :  { %2539 = vmatpush3.msra.mxu1 %v3154_v41 }
 0x1d7   :  { %2540 = vmatprep.subr.mxu1 %v3162_v42 }
 0x1d8   :  { %2541 = vmatpush3.msra.mxu1 %v3162_v42 }
 0x1d9   :  { %2542 = vmatprep.subr.mxu1 %v3170_v43 }
 0x1da   :  { %2543 = vmatpush3.msra.mxu1 %v3170_v43 }
 0x1db   :  { %2544 = vmatprep.subr.mxu1 %v3177_v44 }
 0x1dc   :  { %2545 = vmatpush3.msra.mxu1 %v3177_v44 }
 0x1dd   :  { %2546 = vmatprep.subr.mxu1 %v3184_v45 }
 0x1de   :  { %2547 = vmatpush3.msra.mxu1 %v3184_v45 }
 0x1df   :  { %2548 = vmatprep.subr.mxu1 %v3193_v46 }
 0x1e0   :  { %2549 = vmatpush3.msra.mxu1 %v3193_v46 }
 0x1e1   :  { %2550 = vmatprep.subr.mxu1 %v3200_v47 }
 0x1e2   :  { %2551 = vmatpush3.msra.mxu1 %v3200_v47 }
 0x1e3   :  { %2552 = vmatprep.subr.mxu1 %v3205_v48 }
 0x1e4   :  { %2553 = vmatpush3.msra.mxu1 %v3205_v48 }
 0x1e5   :  { %2554 = vmatprep.subr.mxu1 %v3212_v49 }
 0x1e6   :  { %2555 = vmatpush3.msra.mxu1 %v3212_v49 }
 0x1e7   :  { %2556 = vmatprep.subr.mxu1 %v3219_v50 }
 0x1e8   :  { %2557 = vmatpush3.msra.mxu1 %v3219_v50 }
 0x1e9   :  { %2558 = vmatprep.subr.mxu1 %v3226_v51 }
 0x1ea   :  { %2559 = vmatpush3.msra.mxu1 %v3226_v51 }
 0x1eb   :  { %2560 = vmatprep.subr.mxu1 %v3233_v52 }
 0x1ec   :  { %2561 = vmatpush3.msra.mxu1 %v3233_v52 }
 0x1ed   :  { %2562 = vmatprep.subr.mxu1 %v3240_v53 }
 0x1ee   :  { %2563 = vmatpush3.msra.mxu1 %v3240_v53 }
 0x1ef   :  { %2564 = vmatprep.subr.mxu1 %v3249_v54 }
 0x1f0   :  { %2565 = vmatpush3.msra.mxu1 %v3249_v54 }
 0x1f1   :  { %2566 = vmatprep.subr.mxu1 %v3256_v55 }
 0x1f2   :  { %2567 = vmatpush3.msra.mxu1 %v3256_v55 }
 0x1f3   :  { %2568 = vmatprep.subr.mxu1 %v3262_v56 }
 0x1f4   :  { %2569 = vmatpush3.msra.mxu1 %v3262_v56 }
 0x1f5   :  { %2586 = vmatprep.subr.mxu1 %v3342_v63 }
 0x295   :  { %v761_v36 = vpop.f32.mrf.mxu1 }
 0x296   :  { %v768_v37 = vrot.slane %v761_v36, %v3332_v35  ;;  %v880_v36 = vld [vmem:[%s3957_s4] sm:$0x1] }
 0x297   :  { %v2537_v38 = vpop.f32.mrf.mxu1 }
 0x298   :  { %v769_v39 = vsub.f32 %v3268_v1, %v768_v37  ;;  %v770_v40 = vsub.f32 %v3270_v2, %v768_v37  ;;  %v771_v57 = vsub.f32 %v3274_v12, %v768_v37  ;;  %v772_v60 = vsub.f32 %v3276_v13, %v768_v37  ;;  %v3401_v37 = vld [vmem:[%s3955_s2 + $0x78] sm:$0xff] }
 0x29a   :  { %v773_v58 = vmul.f32 %v769_v39, %v769_v39  ;;  %v774_v59 = vmul.f32 %v770_v40, %v770_v40  ;;  %v775_v61 = vmul.f32 %v771_v57, %v771_v57  ;;  %v776_v62 = vmul.f32 %v772_v60, %v772_v60  ;;  %v3412_v40 = vld [vmem:[%s3955_s2 + $0x70] sm:$0xff]  ;;  %v3426_v57 = vld [vmem:[%s3955_s2 + $0x60] sm:$0xff]  ;;  %v3447_v60 = vld [vmem:[%s3955_s2 + $0x48] sm:$0xff] }
 0x29c   :  { %2570 = vmatprep.mubr.f32.mxu1 %v773_v58  ;;  %v3433_v58 = vld [vmem:[%s3955_s2 + $0x58] sm:$0xff] }
 0x29d   :  { %2571 = vmatmul.mubr.f32.vlgmr.msra.gmra.mxu1 %v774_v59  ;;  %v3440_v59 = vld [vmem:[%s3955_s2 + $0x50] sm:$0xff] }
 0x29e   :  { %2573 = vmatprep.mubr.f32.mxu1 %v775_v61  ;;  %2587 = vmatpush3.msra.mxu1 %v3342_v63  ;;  %v3456_v61 = vld [vmem:[%s3955_s2 + $0xc0] sm:$0xff] }
 0x29f   :  { %2588 = vmatprep.subr.mxu1 %v3347_v0 }
 0x2a0   :  { %2589 = vmatpush3.msra.mxu1 %v3347_v0 }
 0x2a1   :  { %2574 = vmatmul.mubr.f32.gmra.mxu1 %v776_v62  ;;  %2590 = vmatprep.subr.mxu1 %v3354_v4  ;;  %v3463_v62 = vld [vmem:[%s3955_s2 + $0xb8] sm:$0xff] }
 0x2a2   :  { %2591 = vmatpush3.msra.mxu1 %v3354_v4 }
 0x2a3   :  { %2592 = vmatprep.subr.mxu1 %v3361_v5 }
 0x2a4   :  { %2593 = vmatpush3.msra.mxu1 %v3361_v5 }
 0x2a5   :  { %2594 = vmatprep.subr.mxu1 %v3368_v6 }
 0x2a6   :  { %2595 = vmatpush3.msra.mxu1 %v3368_v6 }
 0x2a7   :  { %2596 = vmatprep.subr.mxu1 %v3375_v7 }
 0x2a8   :  { %2597 = vmatpush3.msra.mxu1 %v3375_v7 }
 0x2a9   :  { %2598 = vmatprep.subr.mxu1 %v3382_v8 }
 0x2aa   :  { %2599 = vmatpush3.msra.mxu1 %v3382_v8 }
 0x2ab   :  { %2600 = vmatprep.subr.mxu1 %v3456_v61 }
 0x2ac   :  { %2601 = vmatpush3.msra.mxu1 %v3456_v61 }
 0x2ad   :  { %2602 = vmatprep.subr.mxu1 %v3463_v62 }
 0x2ae   :  { %2603 = vmatpush3.msra.mxu1 %v3463_v62 }
 0x35d   :  { %v2572_v9 = vpop.f32.mrf.mxu1 }
 0x35e   :  { %v863_v16 = vsel %vm676_vm3, %v2572_v9, 0.0  ;;  %v3470_v9 = vld [vmem:[%s3955_s2 + $0xb0] sm:$0xff] }
 0x35f   :  { %v843_v10 = vpop.f32.mrf.mxu1  ;;  %2604 = vmatprep.subr.mxu1 %v3470_v9 }
 0x360   :  { %v862_v11 = vsel %vm676_vm3, %v843_v10, 0.0  ;;  %2605 = vmatpush3.msra.mxu1 %v3470_v9  ;;  %v3477_v10 = vld [vmem:[%s3955_s2 + $0xa8] sm:$0xff] }
 0x361   :  { %v2575_v15 = vpop.f32.mrf.mxu1  ;;  %v864_v17 = vadd.f32 %v863_v16, %v862_v11  ;;  %2606 = vmatprep.subr.mxu1 %v3477_v10  ;;  %v3483_v11 = vld [vmem:[%s3955_s2 + $0x40] sm:$0xff]  ;;  %v3497_v16 = vld [vmem:[%s3955_s2 + $0x38] sm:$0xff] }
 0x362   :  { %v867_v21 = vsel %vm676_vm3, %v2575_v15, 0.0  ;;  %2607 = vmatpush3.msra.mxu1 %v3477_v10  ;;  %v3489_v15 = vld [vmem:[%s3955_s2 + $0xa0] sm:$0xff] }
 0x363   :  { %v853_v18 = vpop.f32.mrf.mxu1  ;;  %2608 = vmatprep.subr.mxu1 %v3489_v15 }
 0x364   :  { %v865_v19 = vsel %vm676_vm3, %v853_v18, 0.0  ;;  %2609 = vmatpush3.msra.mxu1 %v3489_v15  ;;  %v3511_v18 = vld [vmem:[%s3955_s2 + $0x30] sm:$0xff] }
 0x365   :  { %v866_v20 = vadd.f32 %v865_v19, %v864_v17  ;;  %v3503_v17 = vld [vmem:[%s3955_s2 + $0x98] sm:$0xff]  ;;  %v3517_v19 = vld [vmem:[%s3955_s2 + $0x90] sm:$0xff] }
 0x366   :  { %2610 = vmatprep.subr.mxu1 %v3503_v17 }
 0x367   :  { %v868_v22 = vadd.f32 %v867_v21, %v866_v20  ;;  %2611 = vmatpush3.msra.mxu1 %v3503_v17  ;;  %v3525_v20 = vld [vmem:[%s3955_s2 + $0x28] sm:$0xff] }
 0x368   :  { %2612 = vmatprep.subr.mxu1 %v3517_v19  ;;  %v3531_v21 = vld [vmem:[%s3955_s2 + $0x88] sm:$0xff] }
 0x369   :  { %v869_v23 = vrot.slane %v868_v22, 4  ;;  %2613 = vmatpush3.msra.mxu1 %v3517_v19 }
 0x36a   :  { %2614 = vmatprep.subr.mxu1 %v3531_v21 }
 0x36b   :  { %v870_v24 = vadd.f32 %v869_v23, %v868_v22  ;;  %v3539_v22 = vld [vmem:[%s3955_s2 + $0x20] sm:$0xff]  ;;  %2615 = vmatpush3.msra.mxu1 %v3531_v21 }
 0x36c   :  { %v3545_v23 = vld [vmem:[%s3955_s2 + $0x80] sm:$0xff] }
 0x36d   :  { %v871_v25 = vrot.slane %v870_v24, 2  ;;  %2616 = vmatprep.subr.mxu1 %v3545_v23 }
 0x36e   :  { %2617 = vmatpush3.msra.mxu1 %v3545_v23 }
 0x36f   :  { %v872_v26 = vadd.f32 %v871_v25, %v870_v24  ;;  %v3553_v24 = vld [vmem:[%s3955_s2 + $0x18] sm:$0xff] }
 0x370   :  { %v3559_v25 = vld [vmem:[%s3955_s2 + $0x178] sm:$0xff] }
 0x371   :  { %v873_v27 = vrot.slane %v872_v26, 1  ;;  %2656 = vmatprep.subr.mxu1 %v3559_v25 }
 0x373   :  { %v874_v28 = vadd.f32 %v873_v27, %v872_v26  ;;  %v3565_v26 = vld [vmem:[%s3955_s2 + $0x10] sm:$0xff]  ;;  %v3572_v27 = vld [vmem:[%s3955_s2 + $0x8] sm:$0xff] }
 0x375   :  { %v875_v29 = vmul.f32 0.001953125, %v874_v28  ;;  %v3579_v28 = vld [vmem:[%s3955_s2] sm:$0xff] }
 0x377   :  { %v877_v30 = vadd.f32 1e-05, %v875_v29 }
 0x379   :  { %2889 = vrsqrt.f32 %v877_v30 }
 0x386   :  { %v2890_v33 = vpop.eup %2889 }
 0x387   :  { %v879_v34 = vmul.f32 %v2890_v33, %v876_v31 }
 0x389   :  { %2579 = vmatmul.mubr.msk.f32.vlgmr.msra.gmra.mxu0 %vm676_vm3, %v879_v34  ;;  %v881_v38 = vmul.f32 %v879_v34, %v3297_v32  ;;  %v3419_v32 = vld [vmem:[%s3955_s2 + $0x68] sm:$0xff] }
 0x38a   :  { %2582 = vmatpush3.msra.mxu0 %v3283_v14  ;;  %2583 = vmatprep.mubr.msk.f32.mxu0 %vm2911_vm2, %v3961_v3 }
 0x38b   :  { %v882_v39 = vsub.f32 %v880_v36, %v881_v38  ;;  %2621 = vmatprep.subr.mxu0 %v3401_v37 }
 0x38d   :  { %2584 = vmatmul.mubr.msk.f32.vlgmr.msra.gmra.mxu0 %vm676_vm3, %v882_v39 }
 0x38e   :  { %2622 = vmatpush3.msra.mxu0 %v3401_v37 }
 0x38f   :  { %2623 = vmatprep.subr.mxu0 %v3412_v40 }
 0x390   :  { %2624 = vmatpush3.msra.mxu0 %v3412_v40 }
 0x391   :  { %2625 = vmatprep.subr.mxu0 %v3419_v32 }
 0x392   :  { %2626 = vmatpush3.msra.mxu0 %v3419_v32 }
 0x393   :  { %2627 = vmatprep.subr.mxu0 %v3426_v57 }
 0x394   :  { %2628 = vmatpush3.msra.mxu0 %v3426_v57 }
 0x395   :  { %2629 = vmatprep.subr.mxu0 %v3433_v58 }
 0x396   :  { %2630 = vmatpush3.msra.mxu0 %v3433_v58 }
 0x397   :  { %2631 = vmatprep.subr.mxu0 %v3440_v59 }
 0x398   :  { %2632 = vmatpush3.msra.mxu0 %v3440_v59 }
 0x399   :  { %2633 = vmatprep.subr.mxu0 %v3447_v60 }
 0x39a   :  { %2634 = vmatpush3.msra.mxu0 %v3447_v60 }
 0x39b   :  { %2635 = vmatprep.subr.mxu0 %v3483_v11 }
 0x39c   :  { %2636 = vmatpush3.msra.mxu0 %v3483_v11 }
 0x39d   :  { %2637 = vmatprep.subr.mxu0 %v3497_v16 }
 0x39e   :  { %2638 = vmatpush3.msra.mxu0 %v3497_v16 }
 0x39f   :  { %2639 = vmatprep.subr.mxu0 %v3511_v18 }
 0x3a0   :  { %2640 = vmatpush3.msra.mxu0 %v3511_v18 }
 0x3a1   :  { %2641 = vmatprep.subr.mxu0 %v3525_v20 }
 0x3a2   :  { %2642 = vmatpush3.msra.mxu0 %v3525_v20 }
 0x3a3   :  { %2643 = vmatprep.subr.mxu0 %v3539_v22 }
 0x3a4   :  { %2644 = vmatpush3.msra.mxu0 %v3539_v22 }
 0x3a5   :  { %2645 = vmatprep.subr.mxu0 %v3553_v24 }
 0x3a6   :  { %2646 = vmatpush3.msra.mxu0 %v3553_v24 }
 0x3a7   :  { %2647 = vmatprep.subr.mxu0 %v3565_v26 }
 0x3a8   :  { %2648 = vmatpush3.msra.mxu0 %v3565_v26 }
 0x3a9   :  { %2649 = vmatprep.subr.mxu0 %v3572_v27 }
 0x3aa   :  { %2650 = vmatpush3.msra.mxu0 %v3572_v27 }
 0x3ab   :  { %2651 = vmatprep.subr.mxu0 %v3579_v28 }
 0x3ac   :  { %2652 = vmatpush3.msra.mxu0 %v3579_v28 }
 0x3ad   :  { %2691 = vmatprep.subr.mxu0 %v3342_v63 }
 0x449   :  { %v952_v29 = vpop.f32.mrf.mxu0 }
 0x44a   :  { %v1032_v30 = vrot.slane %v952_v29, %v3332_v35 }
 0x44b   :  { %v2580_v31 = vpop.f32.mrf.mxu0 }
 0x44c   :  { %v1033_v33 = vmul.f32 %v1032_v30, %v3268_v1  ;;  %v1034_v36 = vmul.f32 %v1032_v30, %v3270_v2  ;;  %v1035_v38 = vmul.f32 %v1032_v30, %v3274_v12  ;;  %v1036_v39 = vmul.f32 %v1032_v30, %v3276_v13  ;;  %v3621_v2 = vld [vmem:[%s3955_s2 + $0x158] sm:$0xff]  ;;  %v3628_v12 = vld [vmem:[%s3955_s2 + $0x150] sm:$0xff]  ;;  %v3637_v13 = vld [vmem:[%s3955_s2 + $0x148] sm:$0xff] }
 0x44d   :  { %v1025_v34 = vpop.f32.mrf.mxu0 }
 0x44e   :  { %v1040_v3 = vrot.slane %v1025_v34, %v3332_v35 }
 0x44f   :  { %v2585_v56 = vpop.f32.mrf.mxu0 }
 0x450   :  { %v1041_v55 = vadd.f32 %v1040_v3, %v1033_v33  ;;  %v1042_v54 = vadd.f32 %v1040_v3, %v1034_v36  ;;  %v1043_v53 = vadd.f32 %v1040_v3, %v1035_v38  ;;  %v3592_v52 = vadd.f32 %v1040_v3, %v1036_v39  ;;  %v3600_v56 = vld [vmem:[%s3955_s2 + $0x170] sm:$0xff]  ;;  %v3606_v3 = vld [vmem:[%s3955_s2 + $0x168] sm:$0xff] }
 0x452   :  { %v1045_v51 = vmax.f32 %v1041_v55, 0.0  ;;  %v1046_v29 = vmax.f32 %v1042_v54, 0.0  ;;  %v1047_v31 = vmax.f32 %v1043_v53, 0.0  ;;  %v1048_v1 = vmax.f32 %v3592_v52, 0.0 }
 0x454   :  { %1053 = vst [vmem:[#allocation3 + $0x1] sm:$0xff] %v1045_v51  ;;  %1054 = vst [vmem:[#allocation3 + $0x9] sm:$0xff] %v1046_v29  ;;  %2618 = vmatprep.mubr.f32.mxu1 %v1045_v51  ;;  %v3613_v51 = vld [vmem:[%s3955_s2 + $0x160] sm:$0xff] }
 0x455   :  { %1055 = vst [vmem:[#allocation3 + $0x19] sm:$0xff] %v1047_v31  ;;  %1056 = vst [vmem:[#allocation3 + $0x21] sm:$0xff] %v1048_v1  ;;  %2619 = vmatmul.mubr.f32.vlgmr.msra.gmra.mxu1 %v1046_v29 }
 0x456   :  { %2657 = vmatpush3.msra.mxu1 %v3559_v25 }
 0x457   :  { %2658 = vmatprep.subr.mxu1 %v3600_v56 }
 0x458   :  { %2659 = vmatpush3.msra.mxu1 %v3600_v56 }
 0x459   :  { %2660 = vmatprep.subr.mxu1 %v3606_v3 }
 0x45a   :  { %2661 = vmatpush3.msra.mxu1 %v3606_v3 }
 0x45b   :  { %v1057_v53 = vld [vmem:[#allocation3] sm:$0xff]  ;;  %v1058_v54 = vld [vmem:[#allocation3 + $0x8] sm:$0xff]  ;;  %2662 = vmatprep.subr.mxu1 %v3613_v51 }
 0x45c   :  { %v1244_v55 = vld [vmem:[#allocation3 + $0x2] sm:$0xff]  ;;  %2653 = vmatprep.mubr.f32.mxu0 %v1057_v53  ;;  %2663 = vmatpush3.msra.mxu1 %v3613_v51 }
 0x45d   :  { %2688 = vmatprep.mubr.f32.mxu1 %v1244_v55  ;;  %2654 = vmatmul.mubr.f32.vlgmr.msra.gmra.mxu0 %v1058_v54  ;;  %v1342_v52 = vld [vmem:[#allocation3 + $0x20] sm:$0xff]  ;;  %v2893_v55 = vld [vmem:[%s3953_s7 + $0x78] sm:$0xff] }
 0x45e   :  { %2692 = vmatpush3.msra.mxu0 %v3342_v63  ;;  %2723 = vmatprep.mubr.f32.mxu0 %v1047_v31  ;;  %v3646_v63 = vld [vmem:[%s3955_s2 + $0x140] sm:$0xff] }
 0x45f   :  { %2693 = vmatprep.subr.mxu0 %v3347_v0  ;;  %2664 = vmatprep.subr.mxu1 %v3621_v2 }
 0x460   :  { %2694 = vmatpush3.msra.mxu0 %v3347_v0  ;;  %2665 = vmatpush3.msra.mxu1 %v3621_v2  ;;  %v3655_v0 = vld [vmem:[%s3955_s2 + $0x138] sm:$0xff] }
 0x461   :  { %2695 = vmatprep.subr.mxu0 %v3354_v4  ;;  %2666 = vmatprep.subr.mxu1 %v3628_v12 }
 0x462   :  { %2696 = vmatpush3.msra.mxu0 %v3354_v4  ;;  %2667 = vmatpush3.msra.mxu1 %v3628_v12  ;;  %v3664_v4 = vld [vmem:[%s3955_s2 + $0x130] sm:$0xff] }
 0x463   :  { %2697 = vmatprep.subr.mxu0 %v3361_v5  ;;  %2668 = vmatprep.subr.mxu1 %v3637_v13 }
 0x464   :  { %2698 = vmatpush3.msra.mxu0 %v3361_v5  ;;  %2669 = vmatpush3.msra.mxu1 %v3637_v13  ;;  %v3673_v5 = vld [vmem:[%s3955_s2 + $0x128] sm:$0xff] }
 0x465   :  { %2699 = vmatprep.subr.mxu0 %v3368_v6  ;;  %2670 = vmatprep.subr.mxu1 %v3646_v63 }
 0x466   :  { %2700 = vmatpush3.msra.mxu0 %v3368_v6  ;;  %2671 = vmatpush3.msra.mxu1 %v3646_v63  ;;  %v3682_v6 = vld [vmem:[%s3955_s2 + $0x120] sm:$0xff] }
 0x467   :  { %2701 = vmatprep.subr.mxu0 %v3375_v7  ;;  %2672 = vmatprep.subr.mxu1 %v3655_v0 }
 0x468   :  { %2702 = vmatpush3.msra.mxu0 %v3375_v7  ;;  %2673 = vmatpush3.msra.mxu1 %v3655_v0  ;;  %v3691_v7 = vld [vmem:[%s3955_s2 + $0x118] sm:$0xff] }
 0x469   :  { %2703 = vmatprep.subr.mxu0 %v3382_v8  ;;  %2674 = vmatprep.subr.mxu1 %v3664_v4 }
 0x46a   :  { %2704 = vmatpush3.msra.mxu0 %v3382_v8  ;;  %2675 = vmatpush3.msra.mxu1 %v3664_v4  ;;  %v3700_v8 = vld [vmem:[%s3955_s2 + $0x110] sm:$0xff] }
 0x46b   :  { %2705 = vmatprep.subr.mxu0 %v3456_v61  ;;  %2676 = vmatprep.subr.mxu1 %v3673_v5 }
 0x46c   :  { %2706 = vmatpush3.msra.mxu0 %v3456_v61  ;;  %2677 = vmatpush3.msra.mxu1 %v3673_v5  ;;  %v3709_v61 = vld [vmem:[%s3955_s2 + $0x108] sm:$0xff] }
 0x46d   :  { %2707 = vmatprep.subr.mxu0 %v3463_v62  ;;  %2678 = vmatprep.subr.mxu1 %v3682_v6 }
 0x46e   :  { %2708 = vmatpush3.msra.mxu0 %v3463_v62  ;;  %2679 = vmatpush3.msra.mxu1 %v3682_v6  ;;  %v3718_v62 = vld [vmem:[%s3955_s2 + $0x100] sm:$0xff] }
 0x46f   :  { %2709 = vmatprep.subr.mxu0 %v3470_v9  ;;  %2680 = vmatprep.subr.mxu1 %v3691_v7 }
 0x470   :  { %2710 = vmatpush3.msra.mxu0 %v3470_v9  ;;  %2681 = vmatpush3.msra.mxu1 %v3691_v7  ;;  %v1245_v9 = vld [vmem:[#allocation3 + $0xa] sm:$0xff] }
 0x471   :  { %2711 = vmatprep.subr.mxu0 %v3477_v10  ;;  %2682 = vmatprep.subr.mxu1 %v3700_v8 }
 0x472   :  { %2712 = vmatpush3.msra.mxu0 %v3477_v10  ;;  %2683 = vmatpush3.msra.mxu1 %v3700_v8  ;;  %v1341_v10 = vld [vmem:[#allocation3 + $0x18] sm:$0xff] }
 0x473   :  { %2713 = vmatprep.subr.mxu0 %v3489_v15  ;;  %2684 = vmatprep.subr.mxu1 %v3709_v61 }
 0x474   :  { %2714 = vmatpush3.msra.mxu0 %v3489_v15  ;;  %2685 = vmatpush3.msra.mxu1 %v3709_v61  ;;  %v1495_v15 = vld [vmem:[#allocation3 + $0x1a] sm:$0xff] }
 0x475   :  { %2715 = vmatprep.subr.mxu0 %v3503_v17  ;;  %2686 = vmatprep.subr.mxu1 %v3718_v62 }
 0x476   :  { %2716 = vmatpush3.msra.mxu0 %v3503_v17  ;;  %2687 = vmatpush3.msra.mxu1 %v3718_v62 }
 0x477   :  { %2717 = vmatprep.subr.mxu0 %v3517_v19  ;;  %2689 = vmatmul.mubr.f32.vlgmr.msra.gmra.mxu1 %v1245_v9  ;;  %v2906_v9 = vld [vmem:[%s3953_s7 + $0x10] sm:$0xff] }
 0x478   :  { %2718 = vmatpush3.msra.mxu0 %v3517_v19  ;;  %2726 = vmatprep.subr.mxu1 %v3401_v37 }
 0x479   :  { %2719 = vmatprep.subr.mxu0 %v3531_v21  ;;  %2727 = vmatpush3.msra.mxu1 %v3401_v37  ;;  %v1496_v37 = vld [vmem:[#allocation3 + $0x22] sm:$0xff] }
 0x47a   :  { %2720 = vmatpush3.msra.mxu0 %v3531_v21  ;;  %2758 = vmatprep.mubr.f32.mxu1 %v1341_v10  ;;  %v2907_v10 = vld [vmem:[%s3953_s7 + $0x8] sm:$0xff] }
 0x47b   :  { %2721 = vmatprep.subr.mxu0 %v3545_v23  ;;  %2728 = vmatprep.subr.mxu1 %v3412_v40 }
 0x47c   :  { %2722 = vmatpush3.msra.mxu0 %v3545_v23  ;;  %2729 = vmatpush3.msra.mxu1 %v3412_v40  ;;  %v3981_v40 = vmov 0.0  }
 0x47d   :  { %2724 = vmatmul.mubr.f32.vlgmr.msra.gmra.mxu0 %v1048_v1  ;;  %2761 = vmatprep.subr.mxu0 %v3559_v25 }
 0x47e   :  { %2762 = vmatpush3.msra.mxu0 %v3559_v25  ;;  %2793 = vmatprep.mubr.f32.mxu0 %v1495_v15  ;;  %v2908_v15 = vld [vmem:[%s3953_s7] sm:$0xff] }
 0x47f   :  { %2763 = vmatprep.subr.mxu0 %v3600_v56  ;;  %2730 = vmatprep.subr.mxu1 %v3419_v32 }
 0x480   :  { %2764 = vmatpush3.msra.mxu0 %v3600_v56  ;;  %2731 = vmatpush3.msra.mxu1 %v3419_v32 }
 0x481   :  { %2765 = vmatprep.subr.mxu0 %v3606_v3  ;;  %2732 = vmatprep.subr.mxu1 %v3426_v57 }
 0x482   :  { %2766 = vmatpush3.msra.mxu0 %v3606_v3  ;;  %2733 = vmatpush3.msra.mxu1 %v3426_v57 }
 0x483   :  { %2767 = vmatprep.subr.mxu0 %v3613_v51  ;;  %2734 = vmatprep.subr.mxu1 %v3433_v58 }
 0x484   :  { %2768 = vmatpush3.msra.mxu0 %v3613_v51  ;;  %2735 = vmatpush3.msra.mxu1 %v3433_v58 }
 0x485   :  { %2769 = vmatprep.subr.mxu0 %v3621_v2  ;;  %2736 = vmatprep.subr.mxu1 %v3440_v59 }
 0x486   :  { %2770 = vmatpush3.msra.mxu0 %v3621_v2  ;;  %2737 = vmatpush3.msra.mxu1 %v3440_v59  ;;  %v2894_v2 = vld [vmem:[%s3953_s7 + $0x70] sm:$0xff] }
 0x487   :  { %2771 = vmatprep.subr.mxu0 %v3628_v12  ;;  %2738 = vmatprep.subr.mxu1 %v3447_v60 }
 0x488   :  { %2772 = vmatpush3.msra.mxu0 %v3628_v12  ;;  %2739 = vmatpush3.msra.mxu1 %v3447_v60  ;;  %v2895_v12 = vld [vmem:[%s3953_s7 + $0x68] sm:$0xff] }
 0x489   :  { %2773 = vmatprep.subr.mxu0 %v3637_v13  ;;  %2740 = vmatprep.subr.mxu1 %v3483_v11 }
 0x48a   :  { %2774 = vmatpush3.msra.mxu0 %v3637_v13  ;;  %2741 = vmatpush3.msra.mxu1 %v3483_v11  ;;  %v2896_v13 = vld [vmem:[%s3953_s7 + $0x60] sm:$0xff] }
 0x48b   :  { %2775 = vmatprep.subr.mxu0 %v3646_v63  ;;  %2742 = vmatprep.subr.mxu1 %v3497_v16 }
 0x48c   :  { %2776 = vmatpush3.msra.mxu0 %v3646_v63  ;;  %2743 = vmatpush3.msra.mxu1 %v3497_v16  ;;  %v2897_v63 = vld [vmem:[%s3953_s7 + $0x58] sm:$0xff] }
 0x48d   :  { %2777 = vmatprep.subr.mxu0 %v3655_v0  ;;  %2744 = vmatprep.subr.mxu1 %v3511_v18 }
 0x48e   :  { %2778 = vmatpush3.msra.mxu0 %v3655_v0  ;;  %2745 = vmatpush3.msra.mxu1 %v3511_v18  ;;  %v2898_v0 = vld [vmem:[%s3953_s7 + $0x50] sm:$0xff] }
 0x48f   :  { %2779 = vmatprep.subr.mxu0 %v3664_v4  ;;  %2746 = vmatprep.subr.mxu1 %v3525_v20 }
 0x490   :  { %2780 = vmatpush3.msra.mxu0 %v3664_v4  ;;  %2747 = vmatpush3.msra.mxu1 %v3525_v20  ;;  %v2899_v4 = vld [vmem:[%s3953_s7 + $0x48] sm:$0xff] }
 0x491   :  { %2781 = vmatprep.subr.mxu0 %v3673_v5  ;;  %2748 = vmatprep.subr.mxu1 %v3539_v22 }
 0x492   :  { %2782 = vmatpush3.msra.mxu0 %v3673_v5  ;;  %2749 = vmatpush3.msra.mxu1 %v3539_v22  ;;  %v2900_v5 = vld [vmem:[%s3953_s7 + $0x40] sm:$0xff] }
 0x493   :  { %2783 = vmatprep.subr.mxu0 %v3682_v6  ;;  %2750 = vmatprep.subr.mxu1 %v3553_v24 }
 0x494   :  { %2784 = vmatpush3.msra.mxu0 %v3682_v6  ;;  %2751 = vmatpush3.msra.mxu1 %v3553_v24  ;;  %v2901_v6 = vld [vmem:[%s3953_s7 + $0x38] sm:$0xff] }
 0x495   :  { %2785 = vmatprep.subr.mxu0 %v3691_v7  ;;  %2752 = vmatprep.subr.mxu1 %v3565_v26 }
 0x496   :  { %2786 = vmatpush3.msra.mxu0 %v3691_v7  ;;  %2753 = vmatpush3.msra.mxu1 %v3565_v26  ;;  %v2902_v7 = vld [vmem:[%s3953_s7 + $0x30] sm:$0xff] }
 0x497   :  { %2787 = vmatprep.subr.mxu0 %v3700_v8  ;;  %2754 = vmatprep.subr.mxu1 %v3572_v27 }
 0x498   :  { %2788 = vmatpush3.msra.mxu0 %v3700_v8  ;;  %2755 = vmatpush3.msra.mxu1 %v3572_v27  ;;  %v2903_v8 = vld [vmem:[%s3953_s7 + $0x28] sm:$0xff] }
 0x499   :  { %2789 = vmatprep.subr.mxu0 %v3709_v61  ;;  %2756 = vmatprep.subr.mxu1 %v3579_v28 }
 0x49a   :  { %2790 = vmatpush3.msra.mxu0 %v3709_v61  ;;  %2757 = vmatpush3.msra.mxu1 %v3579_v28  ;;  %v2904_v61 = vld [vmem:[%s3953_s7 + $0x20] sm:$0xff] }
 0x49b   :  { %2791 = vmatprep.subr.mxu0 %v3718_v62  ;;  %2759 = vmatmul.mubr.f32.vlgmr.msra.gmra.mxu1 %v1342_v52 }
 0x49c   :  { %2792 = vmatpush3.msra.mxu0 %v3718_v62  ;;  %2796 = vmatprep.subr.mxu1 %v3154_v41  ;;  %v2905_v62 = vld [vmem:[%s3953_s7 + $0x18] sm:$0xff] }
 0x49d   :  { %2794 = vmatmul.mubr.f32.vlgmr.msra.gmra.mxu0 %v1496_v37  ;;  %2797 = vmatpush3.msra.mxu1 %v3154_v41 }
 0x49e   :  { %2798 = vmatprep.subr.mxu1 %v3162_v42  ;;  %2834 = vmatprep.subr.mxu0 %v3981_v40 }
 0x49f   :  { %2799 = vmatpush3.msra.mxu1 %v3162_v42  ;;  %2835 = vmatpush3.msra.mxu0 %v3283_v14  ;;  %v3983_v42 = vld [vmem:[#allocation5_spill] sm:$0xff] }
 0x4a0   :  { %2800 = vmatprep.subr.mxu1 %v3170_v43  ;;  %2836 = vmatprep.mubr.msk.f32.mxu0 %vm2911_vm2, %v3981_v40 }
 0x4a1   :  { %2801 = vmatpush3.msra.mxu1 %v3170_v43  ;;  %2839 = vmatprep.subr.mxu0 %v3154_v41  ;;  %v3982_v41 = vld [vmem:[#allocation4_spill] sm:$0xff]  ;;  %v3984_v43 = vld [vmem:[#allocation6_spill] sm:$0xff] }
 0x4a2   :  { %2802 = vmatprep.subr.mxu1 %v3177_v44 }
 0x4a3   :  { %2803 = vmatpush3.msra.mxu1 %v3177_v44  ;;  %v3985_v44 = vld [vmem:[#allocation7_spill] sm:$0xff] }
 0x4a4   :  { %2804 = vmatprep.subr.mxu1 %v3184_v45 }
 0x4a5   :  { %2805 = vmatpush3.msra.mxu1 %v3184_v45  ;;  %v3986_v45 = vld [vmem:[#allocation8_spill] sm:$0xff] }
 0x4a6   :  { %2806 = vmatprep.subr.mxu1 %v3193_v46 }
 0x4a7   :  { %2807 = vmatpush3.msra.mxu1 %v3193_v46  ;;  %v3987_v46 = vld [vmem:[#allocation9_spill] sm:$0xff] }
 0x4a8   :  { %2808 = vmatprep.subr.mxu1 %v3200_v47 }
 0x4a9   :  { %2809 = vmatpush3.msra.mxu1 %v3200_v47 }
 0x4aa   :  { %2810 = vmatprep.subr.mxu1 %v3205_v48 }
 0x4ab   :  { %2811 = vmatpush3.msra.mxu1 %v3205_v48 }
 0x4ac   :  { %2812 = vmatprep.subr.mxu1 %v3212_v49 }
 0x4ad   :  { %2813 = vmatpush3.msra.mxu1 %v3212_v49 }
 0x4ae   :  { %2814 = vmatprep.subr.mxu1 %v3219_v50 }
 0x4af   :  { %2815 = vmatpush3.msra.mxu1 %v3219_v50 }
 0x4b0   :  { %2816 = vmatprep.subr.mxu1 %v3982_v41 }
 0x4b1   :  { %2817 = vmatpush3.msra.mxu1 %v3982_v41 }
 0x4b2   :  { %2818 = vmatprep.subr.mxu1 %v3983_v42 }
 0x4b3   :  { %2819 = vmatpush3.msra.mxu1 %v3983_v42 }
 0x4b4   :  { %2820 = vmatprep.subr.mxu1 %v3984_v43 }
 0x4b5   :  { %2821 = vmatpush3.msra.mxu1 %v3984_v43 }
 0x4b6   :  { %2822 = vmatprep.subr.mxu1 %v3985_v44 }
 0x4b7   :  { %2823 = vmatpush3.msra.mxu1 %v3985_v44 }
 0x4b8   :  { %2824 = vmatprep.subr.mxu1 %v3986_v45 }
 0x4b9   :  { %2825 = vmatpush3.msra.mxu1 %v3986_v45 }
 0x4ba   :  { %2826 = vmatprep.subr.mxu1 %v3987_v46 }
 0x4bb   :  { %2827 = vmatpush3.msra.mxu1 %v3987_v46 }
 0x4bc   :  { %2877 = vmatprep.subr.mxu1 %v3981_v40 }
 0x515   :  { %v2620_v47 = vpop.f32.mrf.mxu1 }
 0x517   :  { %v1160_v49 = vpop.f32.mrf.mxu1 }
 0x51d   :  { %v2655_v48 = vpop.f32.mrf.mxu0 }
 0x51e   :  { %v1241_v58 = vadd.f32 %v2655_v48, %v2620_v47 }
 0x51f   :  { %v1235_v50 = vpop.f32.mrf.mxu0 }
 0x520   :  { %v1236_v57 = vadd.f32 %v1235_v50, %v1160_v49 }
 0x537   :  { %v2690_v32 = vpop.f32.mrf.mxu1 }
 0x538   :  { %v3840_v11 = vadd.f32 %v2690_v32, %v1241_v58 }
 0x539   :  { %v1329_v59 = vpop.f32.mrf.mxu1 }
 0x53a   :  { %v3838_v60 = vadd.f32 %v1329_v59, %v1236_v57 }
 0x53c   :  { %2828 = vmatprep.mubr.f32.mxu1 %v3838_v60 }
 0x53d   :  { %2829 = vmatmul.mubr.f32.vlgmr.msra.gmra.mxu1 %v3840_v11  ;;  %v2725_v16 = vpop.f32.mrf.mxu0 }
 0x53e   :  { %2878 = vmatpush3.msra.mxu1 %v3283_v14 }
 0x53f   :  { %2882 = vmatprep.subr.mxu1 %v3981_v40  ;;  %v1411_v17 = vpop.f32.mrf.mxu0 }
 0x55b   :  { %v2760_v18 = vpop.f32.mrf.mxu1 }
 0x55c   :  { %v1492_v22 = vadd.f32 %v2760_v18, %v2725_v16 }
 0x55d   :  { %v2795_v19 = vpop.f32.mrf.mxu0  ;;  %v1486_v20 = vpop.f32.mrf.mxu1 }
 0x55e   :  { %v1487_v21 = vadd.f32 %v1486_v20, %v1411_v17  ;;  %v3848_v25 = vadd.f32 %v2795_v19, %v1492_v22 }
 0x55f   :  { %v1563_v23 = vpop.f32.mrf.mxu0 }
 0x560   :  { %v3846_v24 = vadd.f32 %v1563_v23, %v1487_v21 }
 0x562   :  { %2831 = vmatprep.mubr.f32.mxu1 %v3846_v24 }
 0x563   :  { %2832 = vmatmul.mubr.f32.gmra.mxu1 %v3848_v25 }
 0x564   :  { %2879 = vmatprep.mubr.msk.f32.mxu1 %vm2911_vm2, %v3981_v40 }
 0x5fd   :  { %v2830_v14 = vpop.f32.mrf.mxu1 }
 0x5fe   :  { %v1676_v30 = vsel %vm676_vm3, %v2830_v14, 0.0 }
 0x5ff   :  { %v1656_v26 = vpop.f32.mrf.mxu1 }
 0x600   :  { %v1675_v27 = vsel %vm676_vm3, %v1656_v26, 0.0 }
 0x601   :  { %v1677_v33 = vadd.f32 %v1676_v30, %v1675_v27 }
 0x623   :  { %v2833_v28 = vpop.f32.mrf.mxu1 }
 0x624   :  { %v1680_v39 = vsel %vm676_vm3, %v2833_v28, 0.0 }
 0x625   :  { %v1666_v34 = vpop.f32.mrf.mxu1 }
 0x626   :  { %v1678_v36 = vsel %vm676_vm3, %v1666_v34, 0.0  ;;  %v1874_v34 = vld [vmem:[%s3958_s5] sm:$0x1] }
 0x627   :  { %v1679_v38 = vadd.f32 %v1678_v36, %v1677_v33 }
 0x629   :  { %v1681_v29 = vadd.f32 %v1680_v39, %v1679_v38  ;;  %v1878_v39 = vld [vmem:[%s3959_s6] sm:$0x1] }
 0x62b   :  { %v1682_v31 = vrot.slane %v1681_v29, 4 }
 0x62d   :  { %v1683_v1 = vadd.f32 %v1682_v31, %v1681_v29  ;;  %v2909_v31 = vld [vmem:[%s3954_s8] sm:$0xff] }
 0x62f   :  { %v1684_v56 = vrot.slane %v1683_v1, 2 }
 0x631   :  { %v1685_v3 = vadd.f32 %v1684_v56, %v1683_v1 }
 0x633   :  { %v1686_v51 = vrot.slane %v1685_v3, 1 }
 0x635   :  { %v1687_v53 = vadd.f32 %v1686_v51, %v1685_v3 }
 0x637   :  { %v3858_v54 = vmul.f32 0.001953125, %v1687_v53 }
 0x639   :  { %2837 = vmatmul.mubr.msk.f32.vlgmr.msra.gmra.mxu0 %vm676_vm3, %v3858_v54 }
 0x63a   :  { %2840 = vmatpush3.msra.mxu0 %v2893_v55 }
 0x63b   :  { %2841 = vmatprep.subr.mxu0 %v2894_v2 }
 0x63c   :  { %2842 = vmatpush3.msra.mxu0 %v2894_v2 }
 0x63d   :  { %2843 = vmatprep.subr.mxu0 %v2895_v12 }
 0x63e   :  { %2844 = vmatpush3.msra.mxu0 %v2895_v12 }
 0x63f   :  { %2845 = vmatprep.subr.mxu0 %v2896_v13 }
 0x640   :  { %2846 = vmatpush3.msra.mxu0 %v2896_v13 }
 0x641   :  { %2847 = vmatprep.subr.mxu0 %v2897_v63 }
 0x642   :  { %2848 = vmatpush3.msra.mxu0 %v2897_v63 }
 0x643   :  { %2849 = vmatprep.subr.mxu0 %v2898_v0 }
 0x644   :  { %2850 = vmatpush3.msra.mxu0 %v2898_v0 }
 0x645   :  { %2851 = vmatprep.subr.mxu0 %v2899_v4 }
 0x646   :  { %2852 = vmatpush3.msra.mxu0 %v2899_v4 }
 0x647   :  { %2853 = vmatprep.subr.mxu0 %v2900_v5 }
 0x648   :  { %2854 = vmatpush3.msra.mxu0 %v2900_v5 }
 0x649   :  { %2855 = vmatprep.subr.mxu0 %v2901_v6 }
 0x64a   :  { %2856 = vmatpush3.msra.mxu0 %v2901_v6 }
 0x64b   :  { %2857 = vmatprep.subr.mxu0 %v2902_v7 }
 0x64c   :  { %2858 = vmatpush3.msra.mxu0 %v2902_v7 }
 0x64d   :  { %2859 = vmatprep.subr.mxu0 %v2903_v8 }
 0x64e   :  { %2860 = vmatpush3.msra.mxu0 %v2903_v8 }
 0x64f   :  { %2861 = vmatprep.subr.mxu0 %v2904_v61 }
 0x650   :  { %2862 = vmatpush3.msra.mxu0 %v2904_v61 }
 0x651   :  { %2863 = vmatprep.subr.mxu0 %v2905_v62 }
 0x652   :  { %2864 = vmatpush3.msra.mxu0 %v2905_v62 }
 0x653   :  { %2865 = vmatprep.subr.mxu0 %v2906_v9 }
 0x654   :  { %2866 = vmatpush3.msra.mxu0 %v2906_v9 }
 0x655   :  { %2867 = vmatprep.subr.mxu0 %v2907_v10 }
 0x656   :  { %2868 = vmatpush3.msra.mxu0 %v2907_v10 }
 0x657   :  { %2869 = vmatprep.subr.mxu0 %v2908_v15 }
 0x658   :  { %2870 = vmatpush3.msra.mxu0 %v2908_v15 }
 0x6f9   :  { %v1759_v52 = vpop.f32.mrf.mxu0 }
 0x6fa   :  { %v1766_v37 = vrot.slane %v1759_v52, %v3332_v35 }
 0x6fb   :  { %v2838_v41 = vpop.f32.mrf.mxu0 }
 0x6fc   :  { %v1767_v42 = vsub.f32 %v3838_v60, %v1766_v37  ;;  %v1768_v43 = vsub.f32 %v3840_v11, %v1766_v37  ;;  %v1769_v44 = vsub.f32 %v3846_v24, %v1766_v37  ;;  %v1770_v47 = vsub.f32 %v3848_v25, %v1766_v37 }
 0x6fe   :  { %v1771_v45 = vmul.f32 %v1767_v42, %v1767_v42  ;;  %v1772_v46 = vmul.f32 %v1768_v43, %v1768_v43  ;;  %v1773_v48 = vmul.f32 %v1769_v44, %v1769_v44  ;;  %v1774_v49 = vmul.f32 %v1770_v47, %v1770_v47 }
 0x700   :  { %2871 = vmatprep.mubr.f32.mxu0 %v1771_v45 }
 0x701   :  { %2872 = vmatmul.mubr.f32.vlgmr.msra.gmra.mxu0 %v1772_v46 }
 0x702   :  { %2874 = vmatprep.mubr.f32.mxu0 %v1773_v48 }
 0x705   :  { %2875 = vmatmul.mubr.f32.gmra.mxu0 %v1774_v49 }
 0x7c1   :  { %v2873_v50 = vpop.f32.mrf.mxu0 }
 0x7c2   :  { %v1861_v59 = vsel %vm676_vm3, %v2873_v50, 0.0 }
 0x7c3   :  { %v1841_v32 = vpop.f32.mrf.mxu0 }
 0x7c4   :  { %v1860_v57 = vsel %vm676_vm3, %v1841_v32, 0.0 }
 0x7c5   :  { %v2876_v58 = vpop.f32.mrf.mxu0  ;;  %v1862_v16 = vadd.f32 %v1861_v59, %v1860_v57 }
 0x7c6   :  { %v1865_v20 = vsel %vm676_vm3, %v2876_v58, 0.0 }
 0x7c7   :  { %v1851_v17 = vpop.f32.mrf.mxu0 }
 0x7c8   :  { %v1863_v18 = vsel %vm676_vm3, %v1851_v17, 0.0 }
 0x7c9   :  { %v1864_v19 = vadd.f32 %v1863_v18, %v1862_v16 }
 0x7cb   :  { %v1866_v21 = vadd.f32 %v1865_v20, %v1864_v19 }
 0x7cd   :  { %v1867_v22 = vrot.slane %v1866_v21, 4 }
 0x7cf   :  { %v1868_v23 = vadd.f32 %v1867_v22, %v1866_v21 }
 0x7d1   :  { %v1869_v14 = vrot.slane %v1868_v23, 2 }
 0x7d3   :  { %v1870_v26 = vadd.f32 %v1869_v14, %v1868_v23 }
 0x7d5   :  { %v1871_v27 = vrot.slane %v1870_v26, 1 }
 0x7d7   :  { %v1872_v28 = vadd.f32 %v1871_v27, %v1870_v26 }
 0x7d9   :  { %v1873_v30 = vmul.f32 0.001953125, %v1872_v28 }
 0x7db   :  { %v1875_v33 = vadd.f32 1e-05, %v1873_v30 }
 0x7dd   :  { %2891 = vrsqrt.f32 %v1875_v33 }
 0x7ea   :  { %v2892_v36 = vpop.eup %2891 }
 0x7eb   :  { %v1877_v38 = vmul.f32 %v2892_v36, %v1874_v34 }
 0x7ed   :  { %2880 = vmatmul.mubr.msk.f32.vlgmr.msra.gmra.mxu1 %vm676_vm3, %v1877_v38  ;;  %v1879_v29 = vmul.f32 %v1877_v38, %v3858_v54 }
 0x7ee   :  { %2883 = vmatpush3.msra.mxu1 %v2909_v31  ;;  %2884 = vmatprep.mubr.msk.f32.mxu1 %vm2911_vm2, %v3981_v40 }
 0x7ef   :  { %v1880_v1 = vsub.f32 %v1878_v39, %v1879_v29 }
 0x7f1   :  { %2885 = vmatmul.mubr.msk.f32.vlgmr.msra.gmra.mxu1 %vm676_vm3, %v1880_v1 }
 0x8ad   :  { %v1950_v56 = vpop.f32.mrf.mxu1 }
 0x8ae   :  { %v2030_v3 = vrot.slane %v1950_v56, %v3332_v35 }
 0x8af   :  { %v2881_v51 = vpop.f32.mrf.mxu1 }
 0x8b0   :  { %v2031_v53 = vmul.f32 %v2030_v3, %v3838_v60  ;;  %v2032_v54 = vmul.f32 %v2030_v3, %v3840_v11  ;;  %v2033_v2 = vmul.f32 %v2030_v3, %v3846_v24  ;;  %v2034_v12 = vmul.f32 %v2030_v3, %v3848_v25 }
 0x8b1   :  { %v2023_v55 = vpop.f32.mrf.mxu1 }
 0x8b2   :  { %v2038_v13 = vrot.slane %v2023_v55, %v3332_v35 }
 0x8b3   :  { %v2886_v63 = vpop.f32.mrf.mxu1 }
 0x8b4   :  { %v2039_v40 = vadd.f32 %v2038_v13, %v2031_v53  ;;  %v2040_v0 = vadd.f32 %v2038_v13, %v2032_v54  ;;  %v2041_v4 = vadd.f32 %v2038_v13, %v2033_v2  ;;  %v2042_v5 = vadd.f32 %v2038_v13, %v2034_v12 }
 0x8b6   :  { %v2043_v6 = vmax.f32 %v2039_v40, 0.0  ;;  %v2044_v7 = vmax.f32 %v2040_v0, 0.0  ;;  %v2045_v8 = vmax.f32 %v2041_v4, 0.0  ;;  %v2046_v61 = vmax.f32 %v2042_v5, 0.0 }
 0x8b8   :  { %2047 = vst [vmem:[%s3960_s9] sm:$0xff] %v2043_v6  ;;  %2048 = vst [vmem:[%s3960_s9 + $0x8] sm:$0xff] %v2044_v7 }
 0x8b9   :  { %2049 = vst [vmem:[%s3960_s9 + $0x10] sm:$0xff] %v2045_v8  ;;  %2050 = vst [vmem:[%s3960_s9 + $0x18] sm:$0xff] %v2046_v61 }

</bundles_post_ra>
